<compile_context>
chip_gen: v7x
topology: tpu7x:2x2x1
jax: 0.10.0
libtpu: 0.0.40
codegen_flags: <defaults>
</compile_context>

<pallas_src>
import math
import functools

import jax
import jax.numpy as jnp
from jax.experimental import pallas as pl
from jax.experimental.pallas import tpu as pltpu


# ----------------------------------------------------------------------------
# helpers
# ----------------------------------------------------------------------------
def _round_up(x, m):
    return ((x + m - 1) // m) * m


def _pick_tile(dim, align, max_tile):
    """Largest multiple of `align` that divides `dim` and is <= max_tile.
    Assumes dim is a multiple of align."""
    t = min(max_tile, dim)
    t -= t % align
    while t > align and dim % t:
        t -= align
    return max(t, align)


def _vmem_limit(*buf_bytes):
    """Double-buffered footprint estimate + headroom, clamped to a portable
    range (>= default scoped VMEM, <= v7x-safe)."""
    est = 2 * sum(int(b) for b in buf_bytes) + (4 << 20)
    return int(min(max(est, 32 << 20), 60 << 20))


# ----------------------------------------------------------------------------
# Kernel 1: generic (tile_m, K) x (K, tile_n) + bias matmul tile.
# Used for both the hoisted input projection and the vocabulary projection.
# ----------------------------------------------------------------------------
def _matmul_bias_kernel(x_ref, w_ref, b_ref, out_ref):
    out_ref[...] = (
        jnp.dot(x_ref[...], w_ref[...], preferred_element_type=jnp.float32)
        + b_ref[...]
    ).astype(out_ref.dtype)


# ----------------------------------------------------------------------------
# Kernel 2: LSTM recurrence over the whole sequence for one batch block.
# Only h @ W_hh remains on the serial chain (input projection precomputed).
# ----------------------------------------------------------------------------
def _lstm_recurrence_kernel(gin_ref, whh_ref, hs_ref):
    """gin_ref : (T, Bb, 4H) f32  precomputed x@W_ih + (b_ih+b_hh), time-major
       whh_ref : (H, 4H)     bf16 fused hidden->hidden weights (gates i,f,g,o)
       hs_ref  : (T, Bb, H)  bf16 hidden state per timestep (time-major)"""
    T = gin_ref.shape[0]
    Bb = gin_ref.shape[1]
    H = hs_ref.shape[-1]

    def step(t, carry):
        h, c = carry
        # Single fused gate matmul per step (lane-aligned slices when H%128==0;
        # correct-but-shuffled for small H).
        gates = gin_ref[t] + jnp.dot(
            h.astype(whh_ref.dtype), whh_ref[...],
            preferred_element_type=jnp.float32)               # (Bb, 4H) f32
        i_g = jax.nn.sigmoid(gates[:, 0 * H:1 * H])
        f_g = jax.nn.sigmoid(gates[:, 1 * H:2 * H])
        g_g = jnp.tanh(gates[:, 2 * H:3 * H])
        o_g = jax.nn.sigmoid(gates[:, 3 * H:4 * H])
        c = f_g * c + i_g * g_g
        h = o_g * jnp.tanh(c)
        hs_ref[t] = h.astype(hs_ref.dtype)
        return h, c

    h0 = jnp.zeros((Bb, H), jnp.float32)
    c0 = jnp.zeros((Bb, H), jnp.float32)
    if T <= 16:
        carry = (h0, c0)
        for t in range(T):                  # small T: static unroll
            carry = step(t, carry)
    else:
        jax.lax.fori_loop(0, T, step, (h0, c0), unroll=2)


# ----------------------------------------------------------------------------
# Forward pass (PyTorch DecoderRNN.forward semantics)
# ----------------------------------------------------------------------------
@functools.partial(jax.jit, static_argnames=("logits_dtype",))
def decoder_rnn_forward(features, captions, params, logits_dtype=jnp.bfloat16):
    """logits = Linear(LSTM(cat(features.unsqueeze(1), embed(captions)[:, :-1])))
    features: (B, E) f32;  captions: (B, T) int32  ->  (B, T, V) logits_dtype.
    Pass logits_dtype=jnp.float32 to match PyTorch's output dtype exactly."""
    embed_w = params["embed_weight"]        # (V, E)     bf16
    wih_t = params["wih_t"]                 # (E, 4H)    bf16 (gates i,f,g,o)
    whh_t = params["whh_t"]                 # (H, 4H)    bf16
    b_gates = params["b_gates"]             # (1, 4H)    f32  (b_ih + b_hh)
    wlin_t = params["wlin_t"]               # (H, V_pad) bf16
    blin = params["blin"]                   # (1, V_pad) f32

    B, T = captions.shape
    V, E = embed_w.shape
    H = whh_t.shape[0]
    H4 = 4 * H
    V_pad = wlin_t.shape[1]

    # --- sequence assembly, built time-major (no (B,T,E) transpose), bf16 ---
    emb_tm = jnp.take(embed_w, captions.T, axis=0)                  # (T, B, E)
    x_tbe = jnp.concatenate(
        [features[None, :, :].astype(jnp.bfloat16), emb_tm[:-1]], axis=0)

    # --- pad batch to a bf16-sublane multiple (16); keep padding to the end -
    B_pad = _round_up(B, 16)
    if B_pad != B:
        x_tbe = jnp.pad(x_tbe, ((0, 0), (0, B_pad - B), (0, 0)))

    # --- hoisted input projection: gates_in = x @ W_ih + (b_ih + b_hh) ------
    M_in = T * B_pad
    x_2d = x_tbe.reshape(M_in, E)
    tile_mi = _pick_tile(M_in, 16, 512)
    gates_in = pl.pallas_call(
        _matmul_bias_kernel,
        out_shape=jax.ShapeDtypeStruct((M_in, H4), jnp.float32),
        grid_spec=pltpu.PrefetchScalarGridSpec(
            num_scalar_prefetch=0,
            grid=(M_in // tile_mi,),
            in_specs=[
                pl.BlockSpec((tile_mi, E), lambda i: (i, 0)),
                pl.BlockSpec((E, H4), lambda i: (0, 0)),
                pl.BlockSpec((1, H4), lambda i: (0, 0)),
            ],
            out_specs=pl.BlockSpec((tile_mi, H4), lambda i: (i, 0)),
        ),
        compiler_params=pltpu.CompilerParams(
            dimension_semantics=("parallel",),
            vmem_limit_bytes=_vmem_limit(
                tile_mi * E * 2, E * H4 * 2, 8 * H4 * 4, tile_mi * H4 * 4),
        ),
    )(x_2d, wih_t, b_gates)
    gin_tbg = gates_in.reshape(T, B_pad, H4)

    # --- batch-block size for the recurrence (VMEM-bounded; >= 2 blocks when
    #     B_pad >= 32 so v7x's two TensorCores both get work) ----------------
    def rec_bytes(bb):
        return 2 * (T * bb * H4 * 4 + T * bb * H * 2 + H * H4 * 2)

    bb_cap = B_pad // 2 if B_pad >= 32 else B_pad
    block_b = max(16, bb_cap - bb_cap % 16)
    while block_b > 16 and (B_pad % block_b or rec_bytes(block_b) > (24 << 20)):
        block_b -= 16
    num_bb = B_pad // block_b

    hs_tbh = pl.pallas_call(
        _lstm_recurrence_kernel,
        out_shape=jax.ShapeDtypeStruct((T, B_pad, H), jnp.bfloat16),
        grid_spec=pltpu.PrefetchScalarGridSpec(
            num_scalar_prefetch=0,
            grid=(num_bb,),
            in_specs=[
                pl.BlockSpec((T, block_b, H4), lambda b: (0, b, 0)),  # gates_in
                pl.BlockSpec((H, H4), lambda b: (0, 0)),              # W_hh
            ],
            out_specs=pl.BlockSpec((T, block_b, H), lambda b: (0, b, 0)),
        ),
        compiler_params=pltpu.CompilerParams(
            dimension_semantics=("parallel",),   # batch blocks are independent
            vmem_limit_bytes=_vmem_limit(
                T * block_b * H4 * 4, H * H4 * 2, T * block_b * H * 2),
        ),
    )(gin_tbg, whh_t)

    # --- vocabulary projection over the full padded batch -------------------
    # Grid order (V-tiles OUTER, M-tiles INNER): the large (H, V_pad) weight
    # block index only changes on the outer axis, so it is streamed from HBM
    # exactly once; the small hs operand is the one re-streamed.
    hs_2d = jnp.transpose(hs_tbh, (1, 0, 2)).reshape(B_pad * T, H)   # (M, H)
    M = B_pad * T
    tile_v = _pick_tile(V_pad, 256, 512)
    tile_m = _pick_tile(M, 16, 2048)
    out_bytes = jnp.dtype(logits_dtype).itemsize

    logits_2d = pl.pallas_call(
        _matmul_bias_kernel,
        out_shape=jax.ShapeDtypeStruct((M, V_pad), logits_dtype),
        grid_spec=pltpu.PrefetchScalarGridSpec(
            num_scalar_prefetch=0,
            grid=(V_pad // tile_v, M // tile_m),
            in_specs=[
                pl.BlockSpec((tile_m, H), lambda j, i: (i, 0)),     # hs rows
                pl.BlockSpec((H, tile_v), lambda j, i: (0, j)),     # W_lin^T
                pl.BlockSpec((1, tile_v), lambda j, i: (0, j)),     # bias
            ],
            out_specs=pl.BlockSpec((tile_m, tile_v), lambda j, i: (i, j)),
        ),
        compiler_params=pltpu.CompilerParams(
            dimension_semantics=("parallel", "parallel"),
            vmem_limit_bytes=_vmem_limit(
                tile_m * H * 2, H * tile_v * 2, 8 * tile_v * 4,
                tile_m * tile_v * out_bytes),
        ),
    )(hs_2d, wlin_t, blin)

    return logits_2d.reshape(B_pad, T, V_pad)[:B, :, :V]            # (B, T, V)


# ----------------------------------------------------------------------------
# Parameter init mirroring the PyTorch module's __init__
# ----------------------------------------------------------------------------
def init_params(key, embed_size, hidden_size, vocab_size):
    k_emb, k_wih, k_whh, k_bih, k_bhh, k_lin = jax.random.split(key, 6)
    H, E, V = hidden_size, embed_size, vocab_size
    stdv = 1.0 / math.sqrt(H)                 # PyTorch nn.LSTM default init
    V_pad = _round_up(V, 256)                 # lane/256-aligned vocab padding

    embed_weight = jax.random.uniform(k_emb, (V, E), jnp.float32, -0.1, 0.1)
    w_ih = jax.random.uniform(k_wih, (4 * H, E), jnp.float32, -stdv, stdv)
    w_hh = jax.random.uniform(k_whh, (4 * H, H), jnp.float32, -stdv, stdv)
    b_ih = jax.random.uniform(k_bih, (4 * H,), jnp.float32, -stdv, stdv)
    b_hh = jax.random.uniform(k_bhh, (4 * H,), jnp.float32, -stdv, stdv)
    w_lin = jax.random.uniform(k_lin, (V, H), jnp.float32, -0.1, 0.1)
    b_lin = jnp.zeros((V,), jnp.float32)

    wlin_t = jnp.zeros((H, V_pad), jnp.float32).at[:, :V].set(w_lin.T)
    blin = jnp.zeros((1, V_pad), jnp.float32).at[:, :V].set(b_lin[None, :])

    return {
        "embed_weight": embed_weight.astype(jnp.bfloat16),   # (V, E)
        "wih_t": w_ih.T.astype(jnp.bfloat16),                # (E, 4H) i,f,g,o
        "whh_t": w_hh.T.astype(jnp.bfloat16),                # (H, 4H)
        "b_gates": (b_ih + b_hh)[None, :],                   # (1, 4H) f32
        "wlin_t": wlin_t.astype(jnp.bfloat16),               # (H, V_pad)
        "blin": blin,                                        # (1, V_pad) f32
    }


# ----------------------------------------------------------------------------
# Pure-JAX reference (lax.scan).  Mirrors the kernel's bf16 operand rounding
# so the comparison is tight while accumulation stays f32.
# ----------------------------------------------------------------------------
def _reference_forward(features, captions, params):
    f32 = jnp.float32
    embed_w = params["embed_weight"].astype(f32)
    wih = params["wih_t"].astype(f32)          # (E, 4H)
    whh = params["whh_t"].astype(f32)          # (H, 4H)
    b = params["b_gates"]                      # (1, 4H)
    V = params["embed_weight"].shape[0]
    H = params["whh_t"].shape[0]
    wlin = params["wlin_t"][:, :V].astype(f32)
    blin = params["blin"][:, :V]
    B = features.shape[0]

    emb = jnp.take(embed_w, captions, axis=0)                       # (B, T, E)
    x = jnp.concatenate([features[:, None, :], emb[:, :-1, :]], axis=1)
    x = x.astype(jnp.bfloat16).astype(f32)                          # mimic cast
    gin = x @ wih + b                                               # (B, T, 4H)

    def step(carry, g_t):
        h, c = carry
        h_q = h.astype(jnp.bfloat16).astype(f32)                    # mimic cast
        gates = g_t + h_q @ whh
        i = jax.nn.sigmoid(gates[:, 0 * H:1 * H])
        f = jax.nn.sigmoid(gates[:, 1 * H:2 * H])
        g = jnp.tanh(gates[:, 2 * H:3 * H])
        o = jax.nn.sigmoid(gates[:, 3 * H:4 * H])
        c = f * c + i * g
        h = o * jnp.tanh(c)
        return (h, c), h

    init = (jnp.zeros((B, H), f32), jnp.zeros((B, H), f32))
    _, hs = jax.lax.scan(step, init, jnp.transpose(gin, (1, 0, 2)))  # (T, B, H)
    hs = jnp.transpose(hs, (1, 0, 2)).astype(jnp.bfloat16).astype(f32)
    return hs @ wlin + blin                                          # (B, T, V)


if __name__ == "__main__":
    # Small shapes consistent with the module's forward signature.
    B, T = 2, 8            # batch, caption length
    E, H, V = 32, 32, 128  # embed_size, hidden_size, vocab_size

    key = jax.random.PRNGKey(0)
    k_par, k_feat, k_cap = jax.random.split(key, 3)

    params = init_params(k_par, E, H, V)
    features = jax.random.normal(k_feat, (B, E), jnp.float32)
    captions = jax.random.randint(k_cap, (B, T), 0, V, jnp.int32)

    out = jax.block_until_ready(decoder_rnn_forward(features, captions, params))
    assert out.shape == (B, T, V), out.shape

    ref = jax.block_until_ready(_reference_forward(features, captions, params))
    max_err = float(jnp.max(jnp.abs(out.astype(jnp.float32) - ref)))
    # logits are emitted in bf16 (halves the dominant HBM writeback);
    # tolerance sized for bf16 rounding of O(1) logits.
    assert max_err < 3e-2, max_err

    print("KERNEL_OK")
</pallas_src>

<mosaic_0001>
module attributes {stable_mosaic.version = 11 : i64} {
  func.func @_matmul_bias_kernel(%arg0: i32, %arg1: memref<128x32xbf16, #tpu.memory_space<vmem>>, %arg2: memref<32x128xbf16, #tpu.memory_space<vmem>>, %arg3: memref<1x128xf32, #tpu.memory_space<vmem>>, %arg4: memref<128x128xf32, #tpu.memory_space<vmem>>) attributes {dimension_semantics = [#tpu.dimension_semantics<parallel>], iteration_bounds = array<i64: 1>, scalar_prefetch = 0 : i64, scratch_operands = 0 : i64, tpu.core_type = #tpu.core_type<tc>, window_params = [{transform_indices = @transform_0, window_bounds = array<i64: 128, 32>}, {pipeline_mode = #tpu.pipeline_mode<synchronous>, transform_indices = @transform_1, window_bounds = array<i64: 32, 128>}, {pipeline_mode = #tpu.pipeline_mode<synchronous>, transform_indices = @transform_2, window_bounds = array<i64: 1, 128>}, {transform_indices = @transform_3, window_bounds = array<i64: 128, 128>}]} {
    %c0 = arith.constant 0 : index
    %c0_0 = arith.constant 0 : index
    %0 = vector.load %arg1[%c0, %c0_0] : memref<128x32xbf16, #tpu.memory_space<vmem>>, vector<128x32xbf16>
    %c0_1 = arith.constant 0 : index
    %c0_2 = arith.constant 0 : index
    %1 = vector.load %arg2[%c0_1, %c0_2] : memref<32x128xbf16, #tpu.memory_space<vmem>>, vector<32x128xbf16>
    %cst = arith.constant dense<0.000000e+00> : vector<128x128xf32>
    %2 = tpu.matmul %0, %1, %cst {dimension_numbers = #tpu.dot_dimension_numbers<[1], [0], [0], [1], [0, 0, 1, 1], [], []>} : vector<128x32xbf16>, vector<32x128xbf16>, vector<128x128xf32> -> vector<128x128xf32>
    %c0_3 = arith.constant 0 : index
    %c0_4 = arith.constant 0 : index
    %3 = vector.load %arg3[%c0_3, %c0_4] : memref<1x128xf32, #tpu.memory_space<vmem>>, vector<1x128xf32>
    %4 = vector.broadcast %3 : vector<1x128xf32> to vector<128x128xf32>
    %5 = arith.addf %2, %4 : vector<128x128xf32>
    %c0_5 = arith.constant 0 : index
    %c0_6 = arith.constant 0 : index
    %6 = vector.load %arg4[%c0_5, %c0_6] : memref<128x128xf32, #tpu.memory_space<vmem>>, vector<128x128xf32>
    tpu.vector_store %arg4[%c0_5, %c0_6], %5 {strides = array<i32>} : memref<128x128xf32, #tpu.memory_space<vmem>>, vector<128x128xf32>,
    return
  }
  func.func @transform_0(%arg0: i32) -> (i32, i32) {
    %c0_i32 = arith.constant 0 : i32
    %c0_i32_0 = arith.constant 0 : i32
    return %arg0, %c0_i32 : i32, i32
  }
  func.func @transform_1(%arg0: i32) -> (i32, i32) {
    %c0_i32 = arith.constant 0 : i32
    %c0_i32_0 = arith.constant 0 : i32
    %c0_i32_1 = arith.constant 0 : i32
    return %c0_i32, %c0_i32_0 : i32, i32
  }
  func.func @transform_2(%arg0: i32) -> (i32, i32) {
    %c0_i32 = arith.constant 0 : i32
    %c0_i32_0 = arith.constant 0 : i32
    %c0_i32_1 = arith.constant 0 : i32
    return %c0_i32, %c0_i32_0 : i32, i32
  }
  func.func @transform_3(%arg0: i32) -> (i32, i32) {
    %c0_i32 = arith.constant 0 : i32
    %c0_i32_0 = arith.constant 0 : i32
    return %arg0, %c0_i32 : i32, i32
  }
}

module attributes {stable_mosaic.version = 11 : i64} {
  func.func @_lstm_recurrence_kernel(%arg0: i32, %arg1: memref<8x16x128xf32, #tpu.memory_space<vmem>>, %arg2: memref<32x128xbf16, #tpu.memory_space<vmem>>, %arg3: memref<8x16x32xbf16, #tpu.memory_space<vmem>>) attributes {dimension_semantics = [#tpu.dimension_semantics<parallel>], iteration_bounds = array<i64: 1>, scalar_prefetch = 0 : i64, scratch_operands = 0 : i64, tpu.core_type = #tpu.core_type<tc>, window_params = [{transform_indices = @transform_0, window_bounds = array<i64: 8, 16, 128>}, {pipeline_mode = #tpu.pipeline_mode<synchronous>, transform_indices = @transform_1, window_bounds = array<i64: 32, 128>}, {transform_indices = @transform_2, window_bounds = array<i64: 8, 16, 32>}]} {
    %cst = arith.constant 0.000000e+00 : f32
    %0 = vector.broadcast %cst : f32 to vector<16x32xf32>
    %cst_0 = arith.constant 0.000000e+00 : f32
    %1 = vector.broadcast %cst_0 : f32 to vector<16x32xf32>
    %c0 = arith.constant 0 : index
    %c0_1 = arith.constant 0 : index
    %c0_2 = arith.constant 0 : index
    %2 = vector.load %arg1[%c0, %c0_1, %c0_2] : memref<8x16x128xf32, #tpu.memory_space<vmem>>, vector<1x16x128xf32>
    %3 = vector.shape_cast %2 : vector<1x16x128xf32> to vector<16x128xf32>
    %4 = arith.truncf %0 : vector<16x32xf32> to vector<16x32xbf16>
    %c0_3 = arith.constant 0 : index
    %c0_4 = arith.constant 0 : index
    %5 = vector.load %arg2[%c0_3, %c0_4] : memref<32x128xbf16, #tpu.memory_space<vmem>>, vector<32x128xbf16>
    %cst_5 = arith.constant dense<0.000000e+00> : vector<16x128xf32>
    %6 = tpu.matmul %4, %5, %cst_5 {dimension_numbers = #tpu.dot_dimension_numbers<[1], [0], [0], [1], [0, 0, 1, 1], [], []>} : vector<16x32xbf16>, vector<32x128xbf16>, vector<16x128xf32> -> vector<16x128xf32>
    %7 = arith.addf %3, %6 : vector<16x128xf32>
    %8 = vector.extract_strided_slice %7 {offsets = [0, 0], sizes = [16, 32], strides = [1, 1]} : vector<16x128xf32> to vector<16x32xf32>
    %9 = arith.negf %8 : vector<16x32xf32>
    %10 = math.exp %9 : vector<16x32xf32>
    %cst_6 = arith.constant 1.000000e+00 : f32
    %11 = vector.broadcast %cst_6 : f32 to vector<16x32xf32>
    %12 = arith.addf %11, %10 : vector<16x32xf32>
    %13 = arith.divf %11, %12 : vector<16x32xf32>
    %14 = vector.extract_strided_slice %7 {offsets = [0, 32], sizes = [16, 32], strides = [1, 1]} : vector<16x128xf32> to vector<16x32xf32>
    %15 = arith.negf %14 : vector<16x32xf32>
    %16 = math.exp %15 : vector<16x32xf32>
    %cst_7 = arith.constant 1.000000e+00 : f32
    %17 = vector.broadcast %cst_7 : f32 to vector<16x32xf32>
    %18 = arith.addf %17, %16 : vector<16x32xf32>
    %19 = arith.divf %17, %18 : vector<16x32xf32>
    %20 = vector.extract_strided_slice %7 {offsets = [0, 64], sizes = [16, 32], strides = [1, 1]} : vector<16x128xf32> to vector<16x32xf32>
    %21 = math.tanh %20 : vector<16x32xf32>
    %22 = vector.extract_strided_slice %7 {offsets = [0, 96], sizes = [16, 32], strides = [1, 1]} : vector<16x128xf32> to vector<16x32xf32>
    %23 = arith.negf %22 : vector<16x32xf32>
    %24 = math.exp %23 : vector<16x32xf32>
    %cst_8 = arith.constant 1.000000e+00 : f32
    %25 = vector.broadcast %cst_8 : f32 to vector<16x32xf32>
    %26 = arith.addf %25, %24 : vector<16x32xf32>
    %27 = arith.divf %25, %26 : vector<16x32xf32>
    %28 = arith.mulf %19, %1 : vector<16x32xf32>
    %29 = arith.mulf %13, %21 : vector<16x32xf32>
    %30 = arith.addf %28, %29 : vector<16x32xf32>
    %31 = math.tanh %30 : vector<16x32xf32>
    %32 = arith.mulf %27, %31 : vector<16x32xf32>
    %33 = arith.truncf %32 : vector<16x32xf32> to vector<16x32xbf16>
    %c0_9 = arith.constant 0 : index
    %c0_10 = arith.constant 0 : index
    %c0_11 = arith.constant 0 : index
    %34 = vector.load %arg3[%c0_9, %c0_10, %c0_11] : memref<8x16x32xbf16, #tpu.memory_space<vmem>>, vector<1x16x32xbf16>
    %35 = vector.shape_cast %34 : vector<1x16x32xbf16> to vector<16x32xbf16>
    %36 = vector.shape_cast %33 : vector<16x32xbf16> to vector<1x16x32xbf16>
    tpu.vector_store %arg3[%c0_9, %c0_10, %c0_11], %36 {strides = array<i32>} : memref<8x16x32xbf16, #tpu.memory_space<vmem>>, vector<1x16x32xbf16>,
    %c1 = arith.constant 1 : index
    %c0_12 = arith.constant 0 : index
    %c0_13 = arith.constant 0 : index
    %37 = vector.load %arg1[%c1, %c0_12, %c0_13] : memref<8x16x128xf32, #tpu.memory_space<vmem>>, vector<1x16x128xf32>
    %38 = vector.shape_cast %37 : vector<1x16x128xf32> to vector<16x128xf32>
    %39 = arith.truncf %32 : vector<16x32xf32> to vector<16x32xbf16>
    %c0_14 = arith.constant 0 : index
    %c0_15 = arith.constant 0 : index
    %40 = vector.load %arg2[%c0_14, %c0_15] : memref<32x128xbf16, #tpu.memory_space<vmem>>, vector<32x128xbf16>
    %cst_16 = arith.constant dense<0.000000e+00> : vector<16x128xf32>
    %41 = tpu.matmul %39, %40, %cst_16 {dimension_numbers = #tpu.dot_dimension_numbers<[1], [0], [0], [1], [0, 0, 1, 1], [], []>} : vector<16x32xbf16>, vector<32x128xbf16>, vector<16x128xf32> -> vector<16x128xf32>
    %42 = arith.addf %38, %41 : vector<16x128xf32>
    %43 = vector.extract_strided_slice %42 {offsets = [0, 0], sizes = [16, 32], strides = [1, 1]} : vector<16x128xf32> to vector<16x32xf32>
    %44 = arith.negf %43 : vector<16x32xf32>
    %45 = math.exp %44 : vector<16x32xf32>
    %cst_17 = arith.constant 1.000000e+00 : f32
    %46 = vector.broadcast %cst_17 : f32 to vector<16x32xf32>
    %47 = arith.addf %46, %45 : vector<16x32xf32>
    %48 = arith.divf %46, %47 : vector<16x32xf32>
    %49 = vector.extract_strided_slice %42 {offsets = [0, 32], sizes = [16, 32], strides = [1, 1]} : vector<16x128xf32> to vector<16x32xf32>
    %50 = arith.negf %49 : vector<16x32xf32>
    %51 = math.exp %50 : vector<16x32xf32>
    %cst_18 = arith.constant 1.000000e+00 : f32
    %52 = vector.broadcast %cst_18 : f32 to vector<16x32xf32>
    %53 = arith.addf %52, %51 : vector<16x32xf32>
    %54 = arith.divf %52, %53 : vector<16x32xf32>
    %55 = vector.extract_strided_slice %42 {offsets = [0, 64], sizes = [16, 32], strides = [1, 1]} : vector<16x128xf32> to vector<16x32xf32>
    %56 = math.tanh %55 : vector<16x32xf32>
    %57 = vector.extract_strided_slice %42 {offsets = [0, 96], sizes = [16, 32], strides = [1, 1]} : vector<16x128xf32> to vector<16x32xf32>
    %58 = arith.negf %57 : vector<16x32xf32>
    %59 = math.exp %58 : vector<16x32xf32>
    %cst_19 = arith.constant 1.000000e+00 : f32
    %60 = vector.broadcast %cst_19 : f32 to vector<16x32xf32>
    %61 = arith.addf %60, %59 : vector<16x32xf32>
    %62 = arith.divf %60, %61 : vector<16x32xf32>
    %63 = arith.mulf %54, %30 : vector<16x32xf32>
    %64 = arith.mulf %48, %56 : vector<16x32xf32>
    %65 = arith.addf %63, %64 : vector<16x32xf32>
    %66 = math.tanh %65 : vector<16x32xf32>
    %67 = arith.mulf %62, %66 : vector<16x32xf32>
    %68 = arith.truncf %67 : vector<16x32xf32> to vector<16x32xbf16>
    %c1_20 = arith.constant 1 : index
    %c0_21 = arith.constant 0 : index
    %c0_22 = arith.constant 0 : index
    %69 = vector.load %arg3[%c1_20, %c0_21, %c0_22] : memref<8x16x32xbf16, #tpu.memory_space<vmem>>, vector<1x16x32xbf16>
    %70 = vector.shape_cast %69 : vector<1x16x32xbf16> to vector<16x32xbf16>
    %71 = vector.shape_cast %68 : vector<16x32xbf16> to vector<1x16x32xbf16>
    tpu.vector_store %arg3[%c1_20, %c0_21, %c0_22], %71 {strides = array<i32>} : memref<8x16x32xbf16, #tpu.memory_space<vmem>>, vector<1x16x32xbf16>,
    %c2 = arith.constant 2 : index
    %c0_23 = arith.constant 0 : index
    %c0_24 = arith.constant 0 : index
    %72 = vector.load %arg1[%c2, %c0_23, %c0_24] : memref<8x16x128xf32, #tpu.memory_space<vmem>>, vector<1x16x128xf32>
    %73 = vector.shape_cast %72 : vector<1x16x128xf32> to vector<16x128xf32>
    %74 = arith.truncf %67 : vector<16x32xf32> to vector<16x32xbf16>
    %c0_25 = arith.constant 0 : index
    %c0_26 = arith.constant 0 : index
    %75 = vector.load %arg2[%c0_25, %c0_26] : memref<32x128xbf16, #tpu.memory_space<vmem>>, vector<32x128xbf16>
    %cst_27 = arith.constant dense<0.000000e+00> : vector<16x128xf32>
    %76 = tpu.matmul %74, %75, %cst_27 {dimension_numbers = #tpu.dot_dimension_numbers<[1], [0], [0], [1], [0, 0, 1, 1], [], []>} : vector<16x32xbf16>, vector<32x128xbf16>, vector<16x128xf32> -> vector<16x128xf32>
    %77 = arith.addf %73, %76 : vector<16x128xf32>
    %78 = vector.extract_strided_slice %77 {offsets = [0, 0], sizes = [16, 32], strides = [1, 1]} : vector<16x128xf32> to vector<16x32xf32>
    %79 = arith.negf %78 : vector<16x32xf32>
    %80 = math.exp %79 : vector<16x32xf32>
    %cst_28 = arith.constant 1.000000e+00 : f32
    %81 = vector.broadcast %cst_28 : f32 to vector<16x32xf32>
    %82 = arith.addf %81, %80 : vector<16x32xf32>
    %83 = arith.divf %81, %82 : vector<16x32xf32>
    %84 = vector.extract_strided_slice %77 {offsets = [0, 32], sizes = [16, 32], strides = [1, 1]} : vector<16x128xf32> to vector<16x32xf32>
    %85 = arith.negf %84 : vector<16x32xf32>
    %86 = math.exp %85 : vector<16x32xf32>
    %cst_29 = arith.constant 1.000000e+00 : f32
    %87 = vector.broadcast %cst_29 : f32 to vector<16x32xf32>
    %88 = arith.addf %87, %86 : vector<16x32xf32>
    %89 = arith.divf %87, %88 : vector<16x32xf32>
    %90 = vector.extract_strided_slice %77 {offsets = [0, 64], sizes = [16, 32], strides = [1, 1]} : vector<16x128xf32> to vector<16x32xf32>
    %91 = math.tanh %90 : vector<16x32xf32>
    %92 = vector.extract_strided_slice %77 {offsets = [0, 96], sizes = [16, 32], strides = [1, 1]} : vector<16x128xf32> to vector<16x32xf32>
    %93 = arith.negf %92 : vector<16x32xf32>
    %94 = math.exp %93 : vector<16x32xf32>
    %cst_30 = arith.constant 1.000000e+00 : f32
    %95 = vector.broadcast %cst_30 : f32 to vector<16x32xf32>
    %96 = arith.addf %95, %94 : vector<16x32xf32>
    %97 = arith.divf %95, %96 : vector<16x32xf32>
    %98 = arith.mulf %89, %65 : vector<16x32xf32>
    %99 = arith.mulf %83, %91 : vector<16x32xf32>
    %100 = arith.addf %98, %99 : vector<16x32xf32>
    %101 = math.tanh %100 : vector<16x32xf32>
    %102 = arith.mulf %97, %101 : vector<16x32xf32>
    %103 = arith.truncf %102 : vector<16x32xf32> to vector<16x32xbf16>
    %c2_31 = arith.constant 2 : index
    %c0_32 = arith.constant 0 : index
    %c0_33 = arith.constant 0 : index
    %104 = vector.load %arg3[%c2_31, %c0_32, %c0_33] : memref<8x16x32xbf16, #tpu.memory_space<vmem>>, vector<1x16x32xbf16>
    %105 = vector.shape_cast %104 : vector<1x16x32xbf16> to vector<16x32xbf16>
    %106 = vector.shape_cast %103 : vector<16x32xbf16> to vector<1x16x32xbf16>
    tpu.vector_store %arg3[%c2_31, %c0_32, %c0_33], %106 {strides = array<i32>} : memref<8x16x32xbf16, #tpu.memory_space<vmem>>, vector<1x16x32xbf16>,
    %c3 = arith.constant 3 : index
    %c0_34 = arith.constant 0 : index
    %c0_35 = arith.constant 0 : index
    %107 = vector.load %arg1[%c3, %c0_34, %c0_35] : memref<8x16x128xf32, #tpu.memory_space<vmem>>, vector<1x16x128xf32>
    %108 = vector.shape_cast %107 : vector<1x16x128xf32> to vector<16x128xf32>
    %109 = arith.truncf %102 : vector<16x32xf32> to vector<16x32xbf16>
    %c0_36 = arith.constant 0 : index
    %c0_37 = arith.constant 0 : index
    %110 = vector.load %arg2[%c0_36, %c0_37] : memref<32x128xbf16, #tpu.memory_space<vmem>>, vector<32x128xbf16>
    %cst_38 = arith.constant dense<0.000000e+00> : vector<16x128xf32>
    %111 = tpu.matmul %109, %110, %cst_38 {dimension_numbers = #tpu.dot_dimension_numbers<[1], [0], [0], [1], [0, 0, 1, 1], [], []>} : vector<16x32xbf16>, vector<32x128xbf16>, vector<16x128xf32> -> vector<16x128xf32>
    %112 = arith.addf %108, %111 : vector<16x128xf32>
    %113 = vector.extract_strided_slice %112 {offsets = [0, 0], sizes = [16, 32], strides = [1, 1]} : vector<16x128xf32> to vector<16x32xf32>
    %114 = arith.negf %113 : vector<16x32xf32>
    %115 = math.exp %114 : vector<16x32xf32>
    %cst_39 = arith.constant 1.000000e+00 : f32
    %116 = vector.broadcast %cst_39 : f32 to vector<16x32xf32>
    %117 = arith.addf %116, %115 : vector<16x32xf32>
    %118 = arith.divf %116, %117 : vector<16x32xf32>
    %119 = vector.extract_strided_slice %112 {offsets = [0, 32], sizes = [16, 32], strides = [1, 1]} : vector<16x128xf32> to vector<16x32xf32>
    %120 = arith.negf %119 : vector<16x32xf32>
    %121 = math.exp %120 : vector<16x32xf32>
    %cst_40 = arith.constant 1.000000e+00 : f32
    %122 = vector.broadcast %cst_40 : f32 to vector<16x32xf32>
    %123 = arith.addf %122, %121 : vector<16x32xf32>
    %124 = arith.divf %122, %123 : vector<16x32xf32>
    %125 = vector.extract_strided_slice %112 {offsets = [0, 64], sizes = [16, 32], strides = [1, 1]} : vector<16x128xf32> to vector<16x32xf32>
    %126 = math.tanh %125 : vector<16x32xf32>
    %127 = vector.extract_strided_slice %112 {offsets = [0, 96], sizes = [16, 32], strides = [1, 1]} : vector<16x128xf32> to vector<16x32xf32>
    %128 = arith.negf %127 : vector<16x32xf32>
    %129 = math.exp %128 : vector<16x32xf32>
    %cst_41 = arith.constant 1.000000e+00 : f32
    %130 = vector.broadcast %cst_41 : f32 to vector<16x32xf32>
    %131 = arith.addf %130, %129 : vector<16x32xf32>
    %132 = arith.divf %130, %131 : vector<16x32xf32>
    %133 = arith.mulf %124, %100 : vector<16x32xf32>
    %134 = arith.mulf %118, %126 : vector<16x32xf32>
    %135 = arith.addf %133, %134 : vector<16x32xf32>
    %136 = math.tanh %135 : vector<16x32xf32>
    %137 = arith.mulf %132, %136 : vector<16x32xf32>
    %138 = arith.truncf %137 : vector<16x32xf32> to vector<16x32xbf16>
    %c3_42 = arith.constant 3 : index
    %c0_43 = arith.constant 0 : index
    %c0_44 = arith.constant 0 : index
    %139 = vector.load %arg3[%c3_42, %c0_43, %c0_44] : memref<8x16x32xbf16, #tpu.memory_space<vmem>>, vector<1x16x32xbf16>
    %140 = vector.shape_cast %139 : vector<1x16x32xbf16> to vector<16x32xbf16>
    %141 = vector.shape_cast %138 : vector<16x32xbf16> to vector<1x16x32xbf16>
    tpu.vector_store %arg3[%c3_42, %c0_43, %c0_44], %141 {strides = array<i32>} : memref<8x16x32xbf16, #tpu.memory_space<vmem>>, vector<1x16x32xbf16>,
    %c4 = arith.constant 4 : index
    %c0_45 = arith.constant 0 : index
    %c0_46 = arith.constant 0 : index
    %142 = vector.load %arg1[%c4, %c0_45, %c0_46] : memref<8x16x128xf32, #tpu.memory_space<vmem>>, vector<1x16x128xf32>
    %143 = vector.shape_cast %142 : vector<1x16x128xf32> to vector<16x128xf32>
    %144 = arith.truncf %137 : vector<16x32xf32> to vector<16x32xbf16>
    %c0_47 = arith.constant 0 : index
    %c0_48 = arith.constant 0 : index
    %145 = vector.load %arg2[%c0_47, %c0_48] : memref<32x128xbf16, #tpu.memory_space<vmem>>, vector<32x128xbf16>
    %cst_49 = arith.constant dense<0.000000e+00> : vector<16x128xf32>
    %146 = tpu.matmul %144, %145, %cst_49 {dimension_numbers = #tpu.dot_dimension_numbers<[1], [0], [0], [1], [0, 0, 1, 1], [], []>} : vector<16x32xbf16>, vector<32x128xbf16>, vector<16x128xf32> -> vector<16x128xf32>
    %147 = arith.addf %143, %146 : vector<16x128xf32>
    %148 = vector.extract_strided_slice %147 {offsets = [0, 0], sizes = [16, 32], strides = [1, 1]} : vector<16x128xf32> to vector<16x32xf32>
    %149 = arith.negf %148 : vector<16x32xf32>
    %150 = math.exp %149 : vector<16x32xf32>
    %cst_50 = arith.constant 1.000000e+00 : f32
    %151 = vector.broadcast %cst_50 : f32 to vector<16x32xf32>
    %152 = arith.addf %151, %150 : vector<16x32xf32>
    %153 = arith.divf %151, %152 : vector<16x32xf32>
    %154 = vector.extract_strided_slice %147 {offsets = [0, 32], sizes = [16, 32], strides = [1, 1]} : vector<16x128xf32> to vector<16x32xf32>
    %155 = arith.negf %154 : vector<16x32xf32>
    %156 = math.exp %155 : vector<16x32xf32>
    %cst_51 = arith.constant 1.000000e+00 : f32
    %157 = vector.broadcast %cst_51 : f32 to vector<16x32xf32>
    %158 = arith.addf %157, %156 : vector<16x32xf32>
    %159 = arith.divf %157, %158 : vector<16x32xf32>
    %160 = vector.extract_strided_slice %147 {offsets = [0, 64], sizes = [16, 32], strides = [1, 1]} : vector<16x128xf32> to vector<16x32xf32>
    %161 = math.tanh %160 : vector<16x32xf32>
    %162 = vector.extract_strided_slice %147 {offsets = [0, 96], sizes = [16, 32], strides = [1, 1]} : vector<16x128xf32> to vector<16x32xf32>
    %163 = arith.negf %162 : vector<16x32xf32>
    %164 = math.exp %163 : vector<16x32xf32>
    %cst_52 = arith.constant 1.000000e+00 : f32
    %165 = vector.broadcast %cst_52 : f32 to vector<16x32xf32>
    %166 = arith.addf %165, %164 : vector<16x32xf32>
    %167 = arith.divf %165, %166 : vector<16x32xf32>
    %168 = arith.mulf %159, %135 : vector<16x32xf32>
    %169 = arith.mulf %153, %161 : vector<16x32xf32>
    %170 = arith.addf %168, %169 : vector<16x32xf32>
    %171 = math.tanh %170 : vector<16x32xf32>
    %172 = arith.mulf %167, %171 : vector<16x32xf32>
    %173 = arith.truncf %172 : vector<16x32xf32> to vector<16x32xbf16>
    %c4_53 = arith.constant 4 : index
    %c0_54 = arith.constant 0 : index
    %c0_55 = arith.constant 0 : index
    %174 = vector.load %arg3[%c4_53, %c0_54, %c0_55] : memref<8x16x32xbf16, #tpu.memory_space<vmem>>, vector<1x16x32xbf16>
    %175 = vector.shape_cast %174 : vector<1x16x32xbf16> to vector<16x32xbf16>
    %176 = vector.shape_cast %173 : vector<16x32xbf16> to vector<1x16x32xbf16>
    tpu.vector_store %arg3[%c4_53, %c0_54, %c0_55], %176 {strides = array<i32>} : memref<8x16x32xbf16, #tpu.memory_space<vmem>>, vector<1x16x32xbf16>,
    %c5 = arith.constant 5 : index
    %c0_56 = arith.constant 0 : index
    %c0_57 = arith.constant 0 : index
    %177 = vector.load %arg1[%c5, %c0_56, %c0_57] : memref<8x16x128xf32, #tpu.memory_space<vmem>>, vector<1x16x128xf32>
    %178 = vector.shape_cast %177 : vector<1x16x128xf32> to vector<16x128xf32>
    %179 = arith.truncf %172 : vector<16x32xf32> to vector<16x32xbf16>
    %c0_58 = arith.constant 0 : index
    %c0_59 = arith.constant 0 : index
    %180 = vector.load %arg2[%c0_58, %c0_59] : memref<32x128xbf16, #tpu.memory_space<vmem>>, vector<32x128xbf16>
    %cst_60 = arith.constant dense<0.000000e+00> : vector<16x128xf32>
    %181 = tpu.matmul %179, %180, %cst_60 {dimension_numbers = #tpu.dot_dimension_numbers<[1], [0], [0], [1], [0, 0, 1, 1], [], []>} : vector<16x32xbf16>, vector<32x128xbf16>, vector<16x128xf32> -> vector<16x128xf32>
    %182 = arith.addf %178, %181 : vector<16x128xf32>
    %183 = vector.extract_strided_slice %182 {offsets = [0, 0], sizes = [16, 32], strides = [1, 1]} : vector<16x128xf32> to vector<16x32xf32>
    %184 = arith.negf %183 : vector<16x32xf32>
    %185 = math.exp %184 : vector<16x32xf32>
    %cst_61 = arith.constant 1.000000e+00 : f32
    %186 = vector.broadcast %cst_61 : f32 to vector<16x32xf32>
    %187 = arith.addf %186, %185 : vector<16x32xf32>
    %188 = arith.divf %186, %187 : vector<16x32xf32>
    %189 = vector.extract_strided_slice %182 {offsets = [0, 32], sizes = [16, 32], strides = [1, 1]} : vector<16x128xf32> to vector<16x32xf32>
    %190 = arith.negf %189 : vector<16x32xf32>
    %191 = math.exp %190 : vector<16x32xf32>
    %cst_62 = arith.constant 1.000000e+00 : f32
    %192 = vector.broadcast %cst_62 : f32 to vector<16x32xf32>
    %193 = arith.addf %192, %191 : vector<16x32xf32>
    %194 = arith.divf %192, %193 : vector<16x32xf32>
    %195 = vector.extract_strided_slice %182 {offsets = [0, 64], sizes = [16, 32], strides = [1, 1]} : vector<16x128xf32> to vector<16x32xf32>
    %196 = math.tanh %195 : vector<16x32xf32>
    %197 = vector.extract_strided_slice %182 {offsets = [0, 96], sizes = [16, 32], strides = [1, 1]} : vector<16x128xf32> to vector<16x32xf32>
    %198 = arith.negf %197 : vector<16x32xf32>
    %199 = math.exp %198 : vector<16x32xf32>
    %cst_63 = arith.constant 1.000000e+00 : f32
    %200 = vector.broadcast %cst_63 : f32 to vector<16x32xf32>
    %201 = arith.addf %200, %199 : vector<16x32xf32>
    %202 = arith.divf %200, %201 : vector<16x32xf32>
    %203 = arith.mulf %194, %170 : vector<16x32xf32>
    %204 = arith.mulf %188, %196 : vector<16x32xf32>
    %205 = arith.addf %203, %204 : vector<16x32xf32>
    %206 = math.tanh %205 : vector<16x32xf32>
    %207 = arith.mulf %202, %206 : vector<16x32xf32>
    %208 = arith.truncf %207 : vector<16x32xf32> to vector<16x32xbf16>
    %c5_64 = arith.constant 5 : index
    %c0_65 = arith.constant 0 : index
    %c0_66 = arith.constant 0 : index
    %209 = vector.load %arg3[%c5_64, %c0_65, %c0_66] : memref<8x16x32xbf16, #tpu.memory_space<vmem>>, vector<1x16x32xbf16>
    %210 = vector.shape_cast %209 : vector<1x16x32xbf16> to vector<16x32xbf16>
    %211 = vector.shape_cast %208 : vector<16x32xbf16> to vector<1x16x32xbf16>
    tpu.vector_store %arg3[%c5_64, %c0_65, %c0_66], %211 {strides = array<i32>} : memref<8x16x32xbf16, #tpu.memory_space<vmem>>, vector<1x16x32xbf16>,
    %c6 = arith.constant 6 : index
    %c0_67 = arith.constant 0 : index
    %c0_68 = arith.constant 0 : index
    %212 = vector.load %arg1[%c6, %c0_67, %c0_68] : memref<8x16x128xf32, #tpu.memory_space<vmem>>, vector<1x16x128xf32>
    %213 = vector.shape_cast %212 : vector<1x16x128xf32> to vector<16x128xf32>
    %214 = arith.truncf %207 : vector<16x32xf32> to vector<16x32xbf16>
    %c0_69 = arith.constant 0 : index
    %c0_70 = arith.constant 0 : index
    %215 = vector.load %arg2[%c0_69, %c0_70] : memref<32x128xbf16, #tpu.memory_space<vmem>>, vector<32x128xbf16>
    %cst_71 = arith.constant dense<0.000000e+00> : vector<16x128xf32>
    %216 = tpu.matmul %214, %215, %cst_71 {dimension_numbers = #tpu.dot_dimension_numbers<[1], [0], [0], [1], [0, 0, 1, 1], [], []>} : vector<16x32xbf16>, vector<32x128xbf16>, vector<16x128xf32> -> vector<16x128xf32>
    %217 = arith.addf %213, %216 : vector<16x128xf32>
    %218 = vector.extract_strided_slice %217 {offsets = [0, 0], sizes = [16, 32], strides = [1, 1]} : vector<16x128xf32> to vector<16x32xf32>
    %219 = arith.negf %218 : vector<16x32xf32>
    %220 = math.exp %219 : vector<16x32xf32>
    %cst_72 = arith.constant 1.000000e+00 : f32
    %221 = vector.broadcast %cst_72 : f32 to vector<16x32xf32>
    %222 = arith.addf %221, %220 : vector<16x32xf32>
    %223 = arith.divf %221, %222 : vector<16x32xf32>
    %224 = vector.extract_strided_slice %217 {offsets = [0, 32], sizes = [16, 32], strides = [1, 1]} : vector<16x128xf32> to vector<16x32xf32>
    %225 = arith.negf %224 : vector<16x32xf32>
    %226 = math.exp %225 : vector<16x32xf32>
    %cst_73 = arith.constant 1.000000e+00 : f32
    %227 = vector.broadcast %cst_73 : f32 to vector<16x32xf32>
    %228 = arith.addf %227, %226 : vector<16x32xf32>
    %229 = arith.divf %227, %228 : vector<16x32xf32>
    %230 = vector.extract_strided_slice %217 {offsets = [0, 64], sizes = [16, 32], strides = [1, 1]} : vector<16x128xf32> to vector<16x32xf32>
    %231 = math.tanh %230 : vector<16x32xf32>
    %232 = vector.extract_strided_slice %217 {offsets = [0, 96], sizes = [16, 32], strides = [1, 1]} : vector<16x128xf32> to vector<16x32xf32>
    %233 = arith.negf %232 : vector<16x32xf32>
    %234 = math.exp %233 : vector<16x32xf32>
    %cst_74 = arith.constant 1.000000e+00 : f32
    %235 = vector.broadcast %cst_74 : f32 to vector<16x32xf32>
    %236 = arith.addf %235, %234 : vector<16x32xf32>
    %237 = arith.divf %235, %236 : vector<16x32xf32>
    %238 = arith.mulf %229, %205 : vector<16x32xf32>
    %239 = arith.mulf %223, %231 : vector<16x32xf32>
    %240 = arith.addf %238, %239 : vector<16x32xf32>
    %241 = math.tanh %240 : vector<16x32xf32>
    %242 = arith.mulf %237, %241 : vector<16x32xf32>
    %243 = arith.truncf %242 : vector<16x32xf32> to vector<16x32xbf16>
    %c6_75 = arith.constant 6 : index
    %c0_76 = arith.constant 0 : index
    %c0_77 = arith.constant 0 : index
    %244 = vector.load %arg3[%c6_75, %c0_76, %c0_77] : memref<8x16x32xbf16, #tpu.memory_space<vmem>>, vector<1x16x32xbf16>
    %245 = vector.shape_cast %244 : vector<1x16x32xbf16> to vector<16x32xbf16>
    %246 = vector.shape_cast %243 : vector<16x32xbf16> to vector<1x16x32xbf16>
    tpu.vector_store %arg3[%c6_75, %c0_76, %c0_77], %246 {strides = array<i32>} : memref<8x16x32xbf16, #tpu.memory_space<vmem>>, vector<1x16x32xbf16>,
    %c7 = arith.constant 7 : index
    %c0_78 = arith.constant 0 : index
    %c0_79 = arith.constant 0 : index
    %247 = vector.load %arg1[%c7, %c0_78, %c0_79] : memref<8x16x128xf32, #tpu.memory_space<vmem>>, vector<1x16x128xf32>
    %248 = vector.shape_cast %247 : vector<1x16x128xf32> to vector<16x128xf32>
    %249 = arith.truncf %242 : vector<16x32xf32> to vector<16x32xbf16>
    %c0_80 = arith.constant 0 : index
    %c0_81 = arith.constant 0 : index
    %250 = vector.load %arg2[%c0_80, %c0_81] : memref<32x128xbf16, #tpu.memory_space<vmem>>, vector<32x128xbf16>
    %cst_82 = arith.constant dense<0.000000e+00> : vector<16x128xf32>
    %251 = tpu.matmul %249, %250, %cst_82 {dimension_numbers = #tpu.dot_dimension_numbers<[1], [0], [0], [1], [0, 0, 1, 1], [], []>} : vector<16x32xbf16>, vector<32x128xbf16>, vector<16x128xf32> -> vector<16x128xf32>
    %252 = arith.addf %248, %251 : vector<16x128xf32>
    %253 = vector.extract_strided_slice %252 {offsets = [0, 0], sizes = [16, 32], strides = [1, 1]} : vector<16x128xf32> to vector<16x32xf32>
    %254 = arith.negf %253 : vector<16x32xf32>
    %255 = math.exp %254 : vector<16x32xf32>
    %cst_83 = arith.constant 1.000000e+00 : f32
    %256 = vector.broadcast %cst_83 : f32 to vector<16x32xf32>
    %257 = arith.addf %256, %255 : vector<16x32xf32>
    %258 = arith.divf %256, %257 : vector<16x32xf32>
    %259 = vector.extract_strided_slice %252 {offsets = [0, 32], sizes = [16, 32], strides = [1, 1]} : vector<16x128xf32> to vector<16x32xf32>
    %260 = arith.negf %259 : vector<16x32xf32>
    %261 = math.exp %260 : vector<16x32xf32>
    %cst_84 = arith.constant 1.000000e+00 : f32
    %262 = vector.broadcast %cst_84 : f32 to vector<16x32xf32>
    %263 = arith.addf %262, %261 : vector<16x32xf32>
    %264 = arith.divf %262, %263 : vector<16x32xf32>
    %265 = vector.extract_strided_slice %252 {offsets = [0, 64], sizes = [16, 32], strides = [1, 1]} : vector<16x128xf32> to vector<16x32xf32>
    %266 = math.tanh %265 : vector<16x32xf32>
    %267 = vector.extract_strided_slice %252 {offsets = [0, 96], sizes = [16, 32], strides = [1, 1]} : vector<16x128xf32> to vector<16x32xf32>
    %268 = arith.negf %267 : vector<16x32xf32>
    %269 = math.exp %268 : vector<16x32xf32>
    %cst_85 = arith.constant 1.000000e+00 : f32
    %270 = vector.broadcast %cst_85 : f32 to vector<16x32xf32>
    %271 = arith.addf %270, %269 : vector<16x32xf32>
    %272 = arith.divf %270, %271 : vector<16x32xf32>
    %273 = arith.mulf %264, %240 : vector<16x32xf32>
    %274 = arith.mulf %258, %266 : vector<16x32xf32>
    %275 = arith.addf %273, %274 : vector<16x32xf32>
    %276 = math.tanh %275 : vector<16x32xf32>
    %277 = arith.mulf %272, %276 : vector<16x32xf32>
    %278 = arith.truncf %277 : vector<16x32xf32> to vector<16x32xbf16>
    %c7_86 = arith.constant 7 : index
    %c0_87 = arith.constant 0 : index
    %c0_88 = arith.constant 0 : index
    %279 = vector.load %arg3[%c7_86, %c0_87, %c0_88] : memref<8x16x32xbf16, #tpu.memory_space<vmem>>, vector<1x16x32xbf16>
    %280 = vector.shape_cast %279 : vector<1x16x32xbf16> to vector<16x32xbf16>
    %281 = vector.shape_cast %278 : vector<16x32xbf16> to vector<1x16x32xbf16>
    tpu.vector_store %arg3[%c7_86, %c0_87, %c0_88], %281 {strides = array<i32>} : memref<8x16x32xbf16, #tpu.memory_space<vmem>>, vector<1x16x32xbf16>,
    return
  }
  func.func @transform_0(%arg0: i32) -> (i32, i32, i32) {
    %c0_i32 = arith.constant 0 : i32
    %c0_i32_0 = arith.constant 0 : i32
    %c0_i32_1 = arith.constant 0 : i32
    return %c0_i32, %arg0, %c0_i32_0 : i32, i32, i32
  }
  func.func @transform_1(%arg0: i32) -> (i32, i32) {
    %c0_i32 = arith.constant 0 : i32
    %c0_i32_0 = arith.constant 0 : i32
    %c0_i32_1 = arith.constant 0 : i32
    return %c0_i32, %c0_i32_0 : i32, i32
  }
  func.func @transform_2(%arg0: i32) -> (i32, i32, i32) {
    %c0_i32 = arith.constant 0 : i32
    %c0_i32_0 = arith.constant 0 : i32
    %c0_i32_1 = arith.constant 0 : i32
    return %c0_i32, %arg0, %c0_i32_0 : i32, i32, i32
  }
}

module attributes {stable_mosaic.version = 11 : i64} {
  func.func @_matmul_bias_kernel(%arg0: i32, %arg1: i32, %arg2: memref<128x32xbf16, #tpu.memory_space<vmem>>, %arg3: memref<32x256xbf16, #tpu.memory_space<vmem>>, %arg4: memref<1x256xf32, #tpu.memory_space<vmem>>, %arg5: memref<128x256xbf16, #tpu.memory_space<vmem>>) attributes {dimension_semantics = [#tpu.dimension_semantics<parallel>, #tpu.dimension_semantics<parallel>], iteration_bounds = array<i64: 1, 1>, scalar_prefetch = 0 : i64, scratch_operands = 0 : i64, tpu.core_type = #tpu.core_type<tc>, window_params = [{transform_indices = @transform_0, window_bounds = array<i64: 128, 32>}, {transform_indices = @transform_1, window_bounds = array<i64: 32, 256>}, {transform_indices = @transform_2, window_bounds = array<i64: 1, 256>}, {transform_indices = @transform_3, window_bounds = array<i64: 128, 256>}]} {
    %c0 = arith.constant 0 : index
    %c0_0 = arith.constant 0 : index
    %0 = vector.load %arg2[%c0, %c0_0] : memref<128x32xbf16, #tpu.memory_space<vmem>>, vector<128x32xbf16>
    %c0_1 = arith.constant 0 : index
    %c0_2 = arith.constant 0 : index
    %1 = vector.load %arg3[%c0_1, %c0_2] : memref<32x256xbf16, #tpu.memory_space<vmem>>, vector<32x256xbf16>
    %cst = arith.constant dense<0.000000e+00> : vector<128x256xf32>
    %2 = tpu.matmul %0, %1, %cst {dimension_numbers = #tpu.dot_dimension_numbers<[1], [0], [0], [1], [0, 0, 1, 1], [], []>} : vector<128x32xbf16>, vector<32x256xbf16>, vector<128x256xf32> -> vector<128x256xf32>
    %c0_3 = arith.constant 0 : index
    %c0_4 = arith.constant 0 : index
    %3 = vector.load %arg4[%c0_3, %c0_4] : memref<1x256xf32, #tpu.memory_space<vmem>>, vector<1x256xf32>
    %4 = vector.broadcast %3 : vector<1x256xf32> to vector<128x256xf32>
    %5 = arith.addf %2, %4 : vector<128x256xf32>
    %6 = arith.truncf %5 : vector<128x256xf32> to vector<128x256xbf16>
    %c0_5 = arith.constant 0 : index
    %c0_6 = arith.constant 0 : index
    %7 = vector.load %arg5[%c0_5, %c0_6] : memref<128x256xbf16, #tpu.memory_space<vmem>>, vector<128x256xbf16>
    tpu.vector_store %arg5[%c0_5, %c0_6], %6 {strides = array<i32>} : memref<128x256xbf16, #tpu.memory_space<vmem>>, vector<128x256xbf16>,
    return
  }
  func.func @transform_0(%arg0: i32, %arg1: i32) -> (i32, i32) {
    %c0_i32 = arith.constant 0 : i32
    %c0_i32_0 = arith.constant 0 : i32
    return %arg1, %c0_i32 : i32, i32
  }
  func.func @transform_1(%arg0: i32, %arg1: i32) -> (i32, i32) {
    %c0_i32 = arith.constant 0 : i32
    %c0_i32_0 = arith.constant 0 : i32
    return %c0_i32, %arg0 : i32, i32
  }
  func.func @transform_2(%arg0: i32, %arg1: i32) -> (i32, i32) {
    %c0_i32 = arith.constant 0 : i32
    %c0_i32_0 = arith.constant 0 : i32
    return %c0_i32, %arg0 : i32, i32
  }
  func.func @transform_3(%arg0: i32, %arg1: i32) -> (i32, i32) {
    %c0_i32 = arith.constant 0 : i32
    return %arg1, %arg0 : i32, i32
  }
}

</mosaic_0001>

<bundles_post_ra>
// kernel: decoder_rnn_forward.3
= control target key start
LH: loop header
LB: loop body
LE: loop exit
PB: predicated region body
PF: predicated region fallthrough
CT: control target
= control target key end

     0   :  { %vm94_vm0 = vcmask 261120   ;;  %s408_s1 = inlined_call_operand.vmem [shape: bf16[32,128], index: 1, kind: input, shape index: {}]   ;;  %s409_s0 = inlined_call_operand.vmem [shape: bf16[128,32], index: 0, kind: input, shape index: {}]   ;;  %s410_s2 = inlined_call_operand.vmem [shape: f32[1,128], index: 2, kind: input, shape index: {}]   ;;  %s411_s3 = inlined_call_operand.vmem [shape: f32[128,128], index: 3, kind: output, shape index: {}]  }
   0x1   :  { %v289_v0 = vld [vmem:[%s408_s1] sm:$0xff]   ;;  %v290_v1 = vld [vmem:[%s408_s1 + $0x8] sm:$0xff]   ;;  %v295_v6 = vld [vmem:[%s409_s0 + $0x10] sm:$0xff]  }
   0x2   :  { %265 = vmatprep.subr.bf16.mxu0 %v289_v0  ;;  %285 = vmatprep.subr.bf16.mxu1 %v289_v0  ;;  %v291_v2 = vld [vmem:[%s409_s0] sm:$0xff]   ;;  %v293_v4 = vld [vmem:[%s409_s0 + $0x8] sm:$0xff]   ;;  %v296_v7 = vld [vmem:[%s409_s0 + $0x30] sm:$0xff]  }
   0x3   :  { %266 = vmatpush3.bf16.msra.mxu0 %v289_v0  ;;  %287 = vmatpush3.bf16.msra.mxu1 %v289_v0  ;;  %v292_v3 = vld [vmem:[%s409_s0 + $0x20] sm:$0xff]   ;;  %v294_v5 = vld [vmem:[%s409_s0 + $0x28] sm:$0xff]   ;;  %v297_v8 = vld [vmem:[%s409_s0 + $0x18] sm:$0xff]  }
   0x4   :  { %267 = vmatprep.subr.bf16.mxu0 %v290_v1  ;;  %286 = vmatprep.subr.bf16.mxu1 %v290_v1  ;;  %v298_v9 = vld [vmem:[%s409_s0 + $0x38] sm:$0xff]   ;;  %v236_v10 = vld [vmem:[%s410_s2] ss:$0 sm:$0xff] }
   0x5   :  { %269 = vmatprep.mubr.msk.bf16.mxu0 %vm94_vm0, %v291_v2  ;;  %277 = vmatprep.mubr.msk.bf16.mxu1 %vm94_vm0, %v292_v3 }
   0x7   :  { %268 = vmatpush3.bf16.msra.mxu0 %v290_v1  ;;  %288 = vmatpush3.bf16.msra.mxu1 %v290_v1 }
   0xa   :  { %270 = vmatmul.mubr.msk.bf16.vlgmr.msra.gmra.mrb[0].mxu0 %vm94_vm0, %v293_v4  ;;  %278 = vmatmul.mubr.msk.bf16.vlgmr.msra.gmra.mrb[0].mxu1 %vm94_vm0, %v294_v5 }
   0xb   :  { %273 = vmatprep.mubr.msk.bf16.mxu0 %vm94_vm0, %v295_v6  ;;  %281 = vmatprep.mubr.msk.bf16.mxu1 %vm94_vm0, %v296_v7 }
  0x12   :  { %274 = vmatmul.mubr.msk.bf16.gmra.mrb[4].mxu0 %vm94_vm0, %v297_v8  ;;  %282 = vmatmul.mubr.msk.bf16.gmra.mrb[4].mxu1 %vm94_vm0, %v298_v9 }
  0xdd   :  { %v271_v11 = vpop.f32.mrb[0].mxu0  ;;  %v279_v12 = vpop.f32.mrb[0].mxu1 }
  0xde   :  { %v162_v13 = vadd.f32 %v271_v11, %v236_v10  ;;  %v194_v14 = vadd.f32 %v279_v12, %v236_v10  ;;  %v153_v15 = vpop.f32.mrb[1].mxu0  ;;  %v185_v16 = vpop.f32.mrb[1].mxu1 }
  0xdf   :  { %v154_v17 = vadd.f32 %v236_v10, %v153_v15  ;;  %v186_v18 = vadd.f32 %v236_v10, %v185_v16  ;;  %v272_v19 = vpop.f32.mrb[2].mxu0  ;;  %v280_v20 = vpop.f32.mrb[2].mxu1 }
  0xe0   :  { %218 = vst [vmem:[%s411_s3 + $0x10] sm:$0xff] %v162_v13  ;;  %226 = vst [vmem:[%s411_s3 + $0x50] sm:$0xff] %v194_v14  ;;  %v165_v21 = vadd.f32 %v272_v19, %v236_v10  ;;  %v197_v22 = vadd.f32 %v280_v20, %v236_v10  ;;  %v156_v23 = vpop.f32.mrb[3].mxu0  ;;  %v188_v24 = vpop.f32.mrb[3].mxu1 }
  0xe1   :  { %216 = vst [vmem:[%s411_s3] sm:$0xff] %v154_v17  ;;  %224 = vst [vmem:[%s411_s3 + $0x40] sm:$0xff] %v186_v18  ;;  %v157_v25 = vadd.f32 %v236_v10, %v156_v23  ;;  %v189_v26 = vadd.f32 %v236_v10, %v188_v24 }
  0xe2   :  { %219 = vst [vmem:[%s411_s3 + $0x18] sm:$0xff] %v165_v21  ;;  %227 = vst [vmem:[%s411_s3 + $0x58] sm:$0xff] %v197_v22 }
  0xe3   :  { %217 = vst [vmem:[%s411_s3 + $0x8] sm:$0xff] %v157_v25  ;;  %225 = vst [vmem:[%s411_s3 + $0x48] sm:$0xff] %v189_v26 }
  0xe5   :  { %v275_v27 = vpop.f32.mrb[4].mxu0  ;;  %v283_v28 = vpop.f32.mrb[4].mxu1 }
  0xe6   :  { %v178_v29 = vadd.f32 %v275_v27, %v236_v10  ;;  %v210_v30 = vadd.f32 %v283_v28, %v236_v10  ;;  %v169_v31 = vpop.f32.mrb[5].mxu0  ;;  %v201_v32 = vpop.f32.mrb[5].mxu1 }
  0xe7   :  { %v170_v33 = vadd.f32 %v236_v10, %v169_v31  ;;  %v202_v34 = vadd.f32 %v236_v10, %v201_v32  ;;  %v276_v35 = vpop.f32.mrb[6].mxu0  ;;  %v284_v36 = vpop.f32.mrb[6].mxu1 }
  0xe8   :  { %222 = vst [vmem:[%s411_s3 + $0x30] sm:$0xff] %v178_v29  ;;  %230 = vst [vmem:[%s411_s3 + $0x70] sm:$0xff] %v210_v30  ;;  %v181_v37 = vadd.f32 %v276_v35, %v236_v10  ;;  %v213_v38 = vadd.f32 %v284_v36, %v236_v10  ;;  %v172_v39 = vpop.f32.mrb[7].mxu0  ;;  %v204_v40 = vpop.f32.mrb[7].mxu1 }
  0xe9   :  { %220 = vst [vmem:[%s411_s3 + $0x20] sm:$0xff] %v170_v33  ;;  %228 = vst [vmem:[%s411_s3 + $0x60] sm:$0xff] %v202_v34  ;;  %v173_v41 = vadd.f32 %v236_v10, %v172_v39  ;;  %v205_v42 = vadd.f32 %v236_v10, %v204_v40 }
  0xea   :  { %223 = vst [vmem:[%s411_s3 + $0x38] sm:$0xff] %v181_v37  ;;  %231 = vst [vmem:[%s411_s3 + $0x78] sm:$0xff] %v213_v38 }
  0xeb   :  { %221 = vst [vmem:[%s411_s3 + $0x28] sm:$0xff] %v173_v41  ;;  %229 = vst [vmem:[%s411_s3 + $0x68] sm:$0xff] %v205_v42 }

// kernel: decoder_rnn_forward.5
= control target key start
LH: loop header
LB: loop body
LE: loop exit
PB: predicated region body
PF: predicated region fallthrough
CT: control target
= control target key end

     0   :  { %v432_v1 = vmov 0   ;;  %vm107_vm0 = vcmask 261120   ;;  %v37_v13 = vlaneseq  ;;  %s584_s1 = inlined_call_operand.vmem [shape: bf16[32,256], index: 1, kind: input, shape index: {}]   ;;  %s585_s0 = inlined_call_operand.vmem [shape: bf16[128,32], index: 0, kind: input, shape index: {}]   ;;  %s586_s2 = inlined_call_operand.vmem [shape: f32[1,256], index: 2, kind: input, shape index: {}]   ;;  %s587_s3 = inlined_call_operand.vmem [shape: bf16[128,256], index: 3, kind: output, shape index: {}]  }
   0x1   :  { %v418_v0 = vld [vmem:[%s584_s1 + $0x4] ss:$8 sps:$4 sm:$0xff]   ;;  %164 = vmatprep.mubr.bf16.mxu0 %v432_v1  ;;  %204 = vmatprep.mubr.bf16.mxu1 %v432_v1  ;;  %v420_v2 = vld [vmem:[%s584_s1] ss:$8 sps:$4 sm:$0xff]   ;;  %v421_v3 = vld [vmem:[%s584_s1 + $0x14] ss:$8 sps:$4 sm:$0xff]  }
   0x2   :  { %132 = vmatprep.subr.bf16.mxu0 %v418_v0  ;;  %413 = vmatprep.subr.bf16.mxu1 %v418_v0  ;;  %v423_v4 = vld [vmem:[%s584_s1 + $0x10] ss:$8 sps:$4 sm:$0xff]   ;;  %v424_v5 = vld [vmem:[%s585_s0] sm:$0xff]   ;;  %v426_v7 = vld [vmem:[%s585_s0 + $0x8] sm:$0xff]   ;;  %v38_v14 = vshrl.u32 %v37_v13, 7 }
   0x3   :  { %133 = vmatpush1.bf16.msra.mxu0 %v420_v2  ;;  %415 = vmatpush1.bf16.msra.mxu1 %v420_v2  ;;  %v425_v6 = vld [vmem:[%s585_s0 + $0x20] sm:$0xff]   ;;  %v427_v8 = vld [vmem:[%s585_s0 + $0x28] sm:$0xff]   ;;  %v428_v9 = vld [vmem:[%s585_s0 + $0x10] sm:$0xff]  }
   0x4   :  { %134 = vmatprep.subr.bf16.mxu0 %v421_v3  ;;  %414 = vmatprep.subr.bf16.mxu1 %v421_v3  ;;  %v429_v10 = vld [vmem:[%s585_s0 + $0x30] sm:$0xff]   ;;  %v430_v11 = vld [vmem:[%s585_s0 + $0x18] sm:$0xff]   ;;  %v39_v15 = vsub.s32 0, %v38_v14  ;;  %v35_v16 = vld [vmem:[%s586_s2] sm:$0x3]  ;;  %v43_v17 = vsub.s32 1, %v38_v14 }
   0x5   :  { %v431_v12 = vld [vmem:[%s585_s0 + $0x38] sm:$0xff]  }
   0x6   :  { %v500_v18 = vrot.slane %v35_v16, %v39_v15  ;;  %v502_v19 = vrot.slane %v35_v16, %v43_v17 }
   0x7   :  { %135 = vmatpush1.bf16.msra.mxu0 %v423_v4  ;;  %416 = vmatpush1.bf16.msra.mxu1 %v423_v4 }
   0xa   :  { %373 = vmatmul.mubr.msk.bf16.vlgmr.msra.gmra.mrb[0].mxu0 %vm107_vm0, %v424_v5  ;;  %377 = vmatmul.mubr.msk.bf16.vlgmr.msra.gmra.mrb[0].mxu1 %vm107_vm0, %v425_v6 }
   0xb   :  { %174 = vmatprep.mubr.bf16.mxu0 %v432_v1  ;;  %214 = vmatprep.mubr.bf16.mxu1 %v432_v1 }
  0x12   :  { %374 = vmatmul.mubr.msk.bf16.gmra.mrb[4].mxu0 %vm107_vm0, %v426_v7  ;;  %378 = vmatmul.mubr.msk.bf16.gmra.mrb[4].mxu1 %vm107_vm0, %v427_v8 }
  0x13   :  { %184 = vmatprep.mubr.bf16.mxu0 %v432_v1  ;;  %224 = vmatprep.mubr.bf16.mxu1 %v432_v1 }
  0x1a   :  { %375 = vmatmul.mubr.msk.bf16.gmra.mrb[8].mxu0 %vm107_vm0, %v428_v9  ;;  %379 = vmatmul.mubr.msk.bf16.gmra.mrb[8].mxu1 %vm107_vm0, %v429_v10 }
  0x1b   :  { %194 = vmatprep.mubr.bf16.mxu0 %v432_v1  ;;  %234 = vmatprep.mubr.bf16.mxu1 %v432_v1 }
  0x22   :  { %376 = vmatmul.mubr.msk.bf16.gmra.mrb[12].mxu0 %vm107_vm0, %v430_v11  ;;  %380 = vmatmul.mubr.msk.bf16.gmra.mrb[12].mxu1 %vm107_vm0, %v431_v12 }
  0xdd   :  { %v166_v20 = vpop.f32.mrb[0].mxu0  ;;  %v206_v21 = vpop.f32.mrb[0].mxu1 }
  0xde   :  { %v167_v22 = vadd.f32 %v166_v20, %v500_v18  ;;  %v207_v23 = vadd.f32 %v206_v21, %v500_v18  ;;  %v168_v24 = vpop.f32.mrb[1].mxu0  ;;  %v208_v25 = vpop.f32.mrb[1].mxu1 }
  0xdf   :  { %v169_v26 = vadd.f32 %v168_v24, %v502_v19  ;;  %v209_v27 = vadd.f32 %v208_v25, %v502_v19  ;;  %v170_v28 = vpop.f32.mrb[2].mxu0  ;;  %v210_v29 = vpop.f32.mrb[2].mxu1 }
  0xe0   :  { %v171_v30 = vadd.f32 %v170_v28, %v500_v18  ;;  %v211_v31 = vadd.f32 %v210_v29, %v500_v18  ;;  %v172_v32 = vpop.f32.mrb[3].mxu0  ;;  %v212_v33 = vpop.f32.mrb[3].mxu1 }
  0xe1   :  { %v397_v34 = vpack.c.bf16 %v169_v26, %v167_v22  ;;  %v405_v35 = vpack.c.bf16 %v209_v27, %v207_v23  ;;  %v173_v36 = vadd.f32 %v172_v32, %v502_v19  ;;  %v213_v37 = vadd.f32 %v212_v33, %v502_v19 }
  0xe3   :  { %341 = vst [vmem:[%s587_s3] sm:$0xff] %v397_v34  ;;  %349 = vst [vmem:[%s587_s3 + $0x40] sm:$0xff] %v405_v35  ;;  %v398_v38 = vpack.c.bf16 %v173_v36, %v171_v30  ;;  %v406_v39 = vpack.c.bf16 %v213_v37, %v211_v31 }
  0xe5   :  { %342 = vst [vmem:[%s587_s3 + $0x8] sm:$0xff] %v398_v38  ;;  %350 = vst [vmem:[%s587_s3 + $0x48] sm:$0xff] %v406_v39  ;;  %v176_v40 = vpop.f32.mrb[4].mxu0  ;;  %v216_v41 = vpop.f32.mrb[4].mxu1 }
  0xe6   :  { %v177_v42 = vadd.f32 %v176_v40, %v500_v18  ;;  %v217_v43 = vadd.f32 %v216_v41, %v500_v18  ;;  %v178_v44 = vpop.f32.mrb[5].mxu0  ;;  %v218_v45 = vpop.f32.mrb[5].mxu1 }
  0xe7   :  { %v179_v46 = vadd.f32 %v178_v44, %v502_v19  ;;  %v219_v47 = vadd.f32 %v218_v45, %v502_v19  ;;  %v180_v48 = vpop.f32.mrb[6].mxu0  ;;  %v220_v49 = vpop.f32.mrb[6].mxu1 }
  0xe8   :  { %v181_v50 = vadd.f32 %v180_v48, %v500_v18  ;;  %v221_v51 = vadd.f32 %v220_v49, %v500_v18  ;;  %v182_v52 = vpop.f32.mrb[7].mxu0  ;;  %v222_v53 = vpop.f32.mrb[7].mxu1 }
  0xe9   :  { %v399_v54 = vpack.c.bf16 %v179_v46, %v177_v42  ;;  %v407_v55 = vpack.c.bf16 %v219_v47, %v217_v43  ;;  %v183_v56 = vadd.f32 %v182_v52, %v502_v19  ;;  %v223_v57 = vadd.f32 %v222_v53, %v502_v19 }
  0xeb   :  { %343 = vst [vmem:[%s587_s3 + $0x10] sm:$0xff] %v399_v54  ;;  %351 = vst [vmem:[%s587_s3 + $0x50] sm:$0xff] %v407_v55  ;;  %v400_v58 = vpack.c.bf16 %v183_v56, %v181_v50  ;;  %v408_v59 = vpack.c.bf16 %v223_v57, %v221_v51 }
  0xed   :  { %344 = vst [vmem:[%s587_s3 + $0x18] sm:$0xff] %v400_v58  ;;  %352 = vst [vmem:[%s587_s3 + $0x58] sm:$0xff] %v408_v59  ;;  %v186_v60 = vpop.f32.mrb[8].mxu0  ;;  %v226_v61 = vpop.f32.mrb[8].mxu1 }
  0xee   :  { %v187_v62 = vadd.f32 %v186_v60, %v500_v18  ;;  %v227_v63 = vadd.f32 %v226_v61, %v500_v18  ;;  %v188_v0 = vpop.f32.mrb[9].mxu0  ;;  %v228_v1 = vpop.f32.mrb[9].mxu1 }
  0xef   :  { %v189_v2 = vadd.f32 %v188_v0, %v502_v19  ;;  %v229_v3 = vadd.f32 %v228_v1, %v502_v19  ;;  %v190_v4 = vpop.f32.mrb[10].mxu0  ;;  %v230_v5 = vpop.f32.mrb[10].mxu1 }
  0xf0   :  { %v191_v6 = vadd.f32 %v190_v4, %v500_v18  ;;  %v231_v7 = vadd.f32 %v230_v5, %v500_v18  ;;  %v192_v8 = vpop.f32.mrb[11].mxu0  ;;  %v232_v9 = vpop.f32.mrb[11].mxu1 }
  0xf1   :  { %v401_v10 = vpack.c.bf16 %v189_v2, %v187_v62  ;;  %v409_v11 = vpack.c.bf16 %v229_v3, %v227_v63  ;;  %v193_v12 = vadd.f32 %v192_v8, %v502_v19  ;;  %v233_v13 = vadd.f32 %v232_v9, %v502_v19 }
  0xf3   :  { %345 = vst [vmem:[%s587_s3 + $0x20] sm:$0xff] %v401_v10  ;;  %353 = vst [vmem:[%s587_s3 + $0x60] sm:$0xff] %v409_v11  ;;  %v402_v14 = vpack.c.bf16 %v193_v12, %v191_v6  ;;  %v410_v15 = vpack.c.bf16 %v233_v13, %v231_v7 }
  0xf5   :  { %346 = vst [vmem:[%s587_s3 + $0x28] sm:$0xff] %v402_v14  ;;  %354 = vst [vmem:[%s587_s3 + $0x68] sm:$0xff] %v410_v15  ;;  %v196_v16 = vpop.f32.mrb[12].mxu0  ;;  %v236_v17 = vpop.f32.mrb[12].mxu1 }
  0xf6   :  { %v197_v20 = vadd.f32 %v196_v16, %v500_v18  ;;  %v237_v21 = vadd.f32 %v236_v17, %v500_v18  ;;  %v198_v22 = vpop.f32.mrb[13].mxu0  ;;  %v238_v23 = vpop.f32.mrb[13].mxu1 }
  0xf7   :  { %v199_v24 = vadd.f32 %v198_v22, %v502_v19  ;;  %v239_v25 = vadd.f32 %v238_v23, %v502_v19  ;;  %v200_v26 = vpop.f32.mrb[14].mxu0  ;;  %v240_v27 = vpop.f32.mrb[14].mxu1 }
  0xf8   :  { %v201_v28 = vadd.f32 %v200_v26, %v500_v18  ;;  %v241_v29 = vadd.f32 %v240_v27, %v500_v18  ;;  %v202_v30 = vpop.f32.mrb[15].mxu0  ;;  %v242_v31 = vpop.f32.mrb[15].mxu1 }
  0xf9   :  { %v403_v32 = vpack.c.bf16 %v199_v24, %v197_v20  ;;  %v411_v33 = vpack.c.bf16 %v239_v25, %v237_v21  ;;  %v203_v34 = vadd.f32 %v202_v30, %v502_v19  ;;  %v243_v35 = vadd.f32 %v242_v31, %v502_v19 }
  0xfb   :  { %347 = vst [vmem:[%s587_s3 + $0x30] sm:$0xff] %v403_v32  ;;  %355 = vst [vmem:[%s587_s3 + $0x70] sm:$0xff] %v411_v33  ;;  %v404_v36 = vpack.c.bf16 %v203_v34, %v201_v28  ;;  %v412_v37 = vpack.c.bf16 %v243_v35, %v241_v29 }
  0xfd   :  { %348 = vst [vmem:[%s587_s3 + $0x38] sm:$0xff] %v404_v36  ;;  %356 = vst [vmem:[%s587_s3 + $0x78] sm:$0xff] %v412_v37 }

// kernel: decoder_rnn_forward.4
= control target key start
LH: loop header
LB: loop body
LE: loop exit
PB: predicated region body
PF: predicated region fallthrough
CT: control target
= control target key end

     0   :  { %v1390_v0 = vmov 0.0   ;;  %vm1391_vm0 = vmmov 0   ;;  %v1392_v3 = vmov 0   ;;  %s1393_s17 = smov 64   ;;  %s1394_s18 = smov 32   ;;  %vm30_vm1 = vcmask 261120   ;;  %s1750_s1 = inlined_call_operand.vmem [shape: bf16[32,128], index: 1, kind: input, shape index: {}]   ;;  %s1751_s0 = inlined_call_operand.vmem [shape: f32[8,16,128], index: 0, kind: input, shape index: {}]   ;;  %s1752_s2 = inlined_call_operand.vmem [shape: bf16[8,16,32], index: 2, kind: output, shape index: {}]  }
   0x1   :  { %1177 = vmatprep.subr.bf16.mxu0 %v1390_v0  ;;  %v1246_v1 = vld [vmem:[%s1750_s1] sm:$0xff]   ;;  %1181 = vmatprep.mubr.msk.bf16.mxu0 %vm1391_vm0, %v1390_v0  ;;  %v1247_v2 = vld [vmem:[%s1750_s1 + $0x8] sm:$0xff]   ;;  %v1060_v42 = vld [vmem:[%s1751_s0 + $0x10] sm:$0xff]  ;;  %vm137_vm2 = vcmask 257024  }
   0x2   :  { %1185 = vmatprep.subr.bf16.mxu1 %v1390_v0  ;;  %1189 = vmatprep.mubr.msk.bf16.mxu1 %vm1391_vm0, %v1390_v0  ;;  %v12_v4 = vld [vmem:[%s1751_s0] sm:$0xff]  ;;  %v13_v6 = vld [vmem:[%s1751_s0 + $0x8] sm:$0xff]  ;;  %v1061_v44 = vld [vmem:[%s1751_s0 + $0x18] sm:$0xff] }
   0x3   :  { %1178 = vmatpush3.bf16.msra.mxu0 %v1246_v1  ;;  %v1248_v32 = vld [vmem:[%s1750_s1] sm:$0xff]   ;;  %v1249_v33 = vld [vmem:[%s1750_s1 + $0x8] sm:$0xff]  }
   0x4   :  { %1179 = vmatprep.subr.bf16.mxu0 %v1390_v0  ;;  %1186 = vmatpush3.bf16.msra.mxu1 %v1248_v32 }
   0x5   :  { %1187 = vmatprep.subr.bf16.mxu1 %v1390_v0 }
   0x7   :  { %1180 = vmatpush3.bf16.msra.mxu0 %v1247_v2 }
   0x8   :  { %1193 = vmatprep.subr.bf16.mxu0 %v1390_v0  ;;  %1188 = vmatpush3.bf16.msra.mxu1 %v1249_v33 }
   0x9   :  { %1201 = vmatprep.subr.bf16.mxu1 %v1390_v0 }
   0xa   :  { %1182 = vmatmul.mubr.bf16.vlgmr.msra.gmra.mrb[0].mxu0 %v1392_v3 }
   0xb   :  { %1197 = vmatprep.mubr.msk.bf16.mxu0 %vm1391_vm0, %v1390_v0 }
  0xdd   :  { %v68_v5 = vpop.f32.mrb[0].mxu0 }
  0xde   :  { %v75_v7 = vadd.f32 %v68_v5, %v12_v4  ;;  %v1183_v8 = vpop.f32.mrb[1].mxu0 }
  0xdf   :  { %v71_v9 = vpop.f32.mrb[2].mxu0  ;;  %v1251_v8 = vld [vmem:[%s1750_s1 + $0x8] sm:$0xff]  }
  0xe0   :  { %1262 = vtanh.f32 %v75_v7  ;;  %v76_v10 = vadd.f32 %v71_v9, %v13_v6  ;;  %v1184_v11 = vpop.f32.mrb[3].mxu0  ;;  %v1056_v14 = vmul.f32 -1.442695, %v75_v7  ;;  %v1250_v7 = vld [vmem:[%s1750_s1] sm:$0xff]  }
  0xe1   :  { %1194 = vmatpush3.bf16.msra.mxu0 %v1250_v7 }
  0xe2   :  { %1264 = vtanh.f32 %v76_v10  ;;  %v1057_v15 = vmul.f32 -1.442695, %v76_v10  ;;  %1195 = vmatprep.subr.bf16.mxu0 %v1390_v0 }
  0xe3   :  { %1266 = vpow2.f32 %v1056_v14 }
  0xe4   :  { %1268 = vpow2.f32 %v1057_v15 }
  0xe5   :  { %1196 = vmatpush3.bf16.msra.mxu0 %v1251_v8 }
  0xe6   :  { %1209 = vmatprep.subr.bf16.mxu0 %v1390_v0 }
  0xea   :  { %v1263_v12 = vpop.eup %1262 }
  0xeb   :  { %95 = vrot.lane.b32.xlu0 %v1263_v12, %s1393_s17 }
  0xec   :  { %v1265_v13 = vpop.eup %1264 }
  0xed   :  { %v1267_v16 = vpop.eup %1266 }
  0xee   :  { %v83_v17 = vadd.f32 1.0, %v1267_v16  ;;  %v1269_v18 = vpop.eup %1268 }
  0xef   :  { %97 = vrot.lane.b32.xlu0 %v1265_v13, %s1393_s17  ;;  %v84_v19 = vadd.f32 1.0, %v1269_v18 }
  0xf0   :  { %1270 = vrcp.f32 %v83_v17  ;;  %v1071_v17 = vld [vmem:[%s1751_s0 + $0x20] sm:$0xff] }
  0xf1   :  { %1272 = vrcp.f32 %v84_v19  ;;  %v1072_v19 = vld [vmem:[%s1751_s0 + $0x28] sm:$0xff] }
  0xfa   :  { %v1271_v20 = vpop.eup %1270 }
  0xfb   :  { %v1273_v23 = vpop.eup %1272  ;;  %v91_v26 = vmul.f32 0.0, %v1271_v20 }
  0xfc   :  { %v92_v29 = vmul.f32 0.0, %v1273_v23 }
 0x15d   :  { %v96_v21 = vpop.permute.xlu0 %95 }
 0x15e   :  { %v101_v22 = vmul.f32 %v1271_v20, %v96_v21 }
 0x160   :  { %105 = vrot.lane.b32.xlu1 %v101_v22, %s1394_s18 }
 0x161   :  { %v98_v24 = vpop.permute.xlu0 %97 }
 0x162   :  { %v102_v25 = vmul.f32 %v1273_v23, %v98_v24 }
 0x164   :  { %107 = vrot.lane.b32.xlu1 %v102_v25, %s1394_s18 }
 0x1d2   :  { %v106_v27 = vpop.permute.xlu1 %105 }
 0x1d3   :  { %v111_v28 = vadd.f32 %v106_v27, %v91_v26 }
 0x1d5   :  { %1274 = vtanh.f32 %v111_v28 }
 0x1d6   :  { %v108_v30 = vpop.permute.xlu1 %107 }
 0x1d7   :  { %v112_v31 = vadd.f32 %v108_v30, %v92_v29 }
 0x1d9   :  { %1276 = vtanh.f32 %v112_v31 }
 0x1df   :  { %v1275_v34 = vpop.eup %1274 }
 0x1e0   :  { %117 = vrot.lane.b32.xlu0 %v1275_v34, %s1393_s17 }
 0x1e3   :  { %v1277_v35 = vpop.eup %1276 }
 0x1e4   :  { %119 = vrot.lane.b32.xlu1 %v1277_v35, %s1393_s17 }
 0x252   :  { %v118_v36 = vpop.permute.xlu0 %117 }
 0x253   :  { %v1446_v38 = vmul.f32 %v1271_v20, %v118_v36 }
 0x256   :  { %v120_v37 = vpop.permute.xlu1 %119 }
 0x257   :  { %v1448_v39 = vmul.f32 %v1273_v23, %v120_v37 }
 0x259   :  { %v125_v40 = vpack.c.bf16 %v1448_v39, %v1446_v38 }
 0x25b   :  { %147 = vrot.lane.b32.xlu0 %v125_v40, %s1394_s18 }
 0x2cd   :  { %v148_v41 = vpop.permute.xlu0 %147 }
 0x2ce   :  { %1190 = vmatmul.mubr.msk.bf16.vlgmr.msra.gmra.mrb[0].mxu1 %vm30_vm1, %v148_v41 }
 0x2cf   :  { %1205 = vmatprep.mubr.msk.bf16.mxu1 %vm1391_vm0, %v1390_v0 }
 0x3a1   :  { %v198_v43 = vpop.f32.mrb[0].mxu1 }
 0x3a2   :  { %v205_v45 = vadd.f32 %v1060_v42, %v198_v43  ;;  %v1191_v46 = vpop.f32.mrb[1].mxu1 }
 0x3a3   :  { %v201_v47 = vpop.f32.mrb[2].mxu1 }
 0x3a4   :  { %1278 = vtanh.f32 %v205_v45  ;;  %v206_v48 = vadd.f32 %v1061_v44, %v201_v47  ;;  %v1192_v49 = vpop.f32.mrb[3].mxu1  ;;  %v1065_v52 = vmul.f32 -1.442695, %v205_v45  ;;  %v1252_v47 = vld [vmem:[%s1750_s1] sm:$0xff]  }
 0x3a5   :  { %1202 = vmatpush3.bf16.msra.mxu1 %v1252_v47 }
 0x3a6   :  { %1280 = vtanh.f32 %v206_v48  ;;  %v1066_v53 = vmul.f32 -1.442695, %v206_v48  ;;  %v1253_v48 = vld [vmem:[%s1750_s1 + $0x8] sm:$0xff]   ;;  %1203 = vmatprep.subr.bf16.mxu1 %v1390_v0 }
 0x3a7   :  { %1282 = vpow2.f32 %v1065_v52 }
 0x3a8   :  { %1284 = vpow2.f32 %v1066_v53 }
 0x3a9   :  { %1204 = vmatpush3.bf16.msra.mxu1 %v1253_v48 }
 0x3aa   :  { %1217 = vmatprep.subr.bf16.mxu1 %v1390_v0 }
 0x3ae   :  { %v1279_v50 = vpop.eup %1278 }
 0x3af   :  { %225 = vrot.lane.b32.xlu1 %v1279_v50, %s1393_s17 }
 0x3b0   :  { %v1281_v51 = vpop.eup %1280 }
 0x3b1   :  { %227 = vrot.lane.b32.xlu0 %v1281_v51, %s1393_s17  ;;  %v1283_v54 = vpop.eup %1282 }
 0x3b2   :  { %v1285_v55 = vpop.eup %1284  ;;  %v213_v56 = vadd.f32 1.0, %v1283_v54 }
 0x3b3   :  { %v214_v57 = vadd.f32 1.0, %v1285_v55 }
 0x3b4   :  { %1286 = vrcp.f32 %v213_v56 }
 0x3b5   :  { %1288 = vrcp.f32 %v214_v57  ;;  %v1082_v57 = vld [vmem:[%s1751_s0 + $0x30] sm:$0xff] }
 0x3be   :  { %v1287_v58 = vpop.eup %1286 }
 0x3bf   :  { %v1289_v61 = vpop.eup %1288  ;;  %v221_v1 = vmul.f32 %v1287_v58, %v111_v28 }
 0x3c0   :  { %v222_v4 = vmul.f32 %v1289_v61, %v112_v31 }
 0x421   :  { %v226_v59 = vpop.permute.xlu1 %225 }
 0x422   :  { %v231_v60 = vmul.f32 %v1287_v58, %v226_v59  ;;  %v1083_v59 = vld [vmem:[%s1751_s0 + $0x38] sm:$0xff] }
 0x423   :  { %v228_v62 = vpop.permute.xlu0 %227 }
 0x424   :  { %235 = vrot.lane.b32.xlu1 %v231_v60, %s1394_s18  ;;  %v232_v63 = vmul.f32 %v1289_v61, %v228_v62 }
 0x426   :  { %237 = vrot.lane.b32.xlu0 %v232_v63, %s1394_s18 }
 0x496   :  { %v236_v2 = vpop.permute.xlu1 %235 }
 0x497   :  { %v241_v3 = vadd.f32 %v236_v2, %v221_v1 }
 0x498   :  { %v238_v5 = vpop.permute.xlu0 %237 }
 0x499   :  { %1290 = vtanh.f32 %v241_v3  ;;  %v242_v6 = vadd.f32 %v238_v5, %v222_v4 }
 0x49b   :  { %1292 = vtanh.f32 %v242_v6 }
 0x4a3   :  { %v1291_v9 = vpop.eup %1290 }
 0x4a4   :  { %247 = vrot.lane.b32.xlu1 %v1291_v9, %s1393_s17 }
 0x4a5   :  { %v1293_v10 = vpop.eup %1292 }
 0x4a6   :  { %249 = vrot.lane.b32.xlu0 %v1293_v10, %s1393_s17 }
 0x516   :  { %v248_v11 = vpop.permute.xlu1 %247 }
 0x517   :  { %v1476_v13 = vmul.f32 %v1287_v58, %v248_v11 }
 0x518   :  { %v250_v12 = vpop.permute.xlu0 %249 }
 0x519   :  { %v1478_v14 = vmul.f32 %v1289_v61, %v250_v12 }
 0x51b   :  { %v255_v15 = vpack.c.bf16 %v1478_v14, %v1476_v13 }
 0x51d   :  { %277 = vrot.lane.b32.xlu1 %v255_v15, %s1394_s18 }
 0x58f   :  { %v278_v16 = vpop.permute.xlu1 %277 }
 0x590   :  { %1198 = vmatmul.mubr.msk.bf16.vlgmr.msra.gmra.mrb[4].mxu0 %vm30_vm1, %v278_v16 }
 0x591   :  { %1213 = vmatprep.mubr.msk.bf16.mxu0 %vm1391_vm0, %v1390_v0 }
 0x663   :  { %v328_v18 = vpop.f32.mrb[4].mxu0 }
 0x664   :  { %v335_v20 = vadd.f32 %v1071_v17, %v328_v18  ;;  %v1199_v21 = vpop.f32.mrb[5].mxu0 }
 0x665   :  { %v331_v22 = vpop.f32.mrb[6].mxu0 }
 0x666   :  { %1294 = vtanh.f32 %v335_v20  ;;  %v336_v23 = vadd.f32 %v1072_v19, %v331_v22  ;;  %v1200_v24 = vpop.f32.mrb[7].mxu0  ;;  %v1076_v27 = vmul.f32 -1.442695, %v335_v20 }
 0x667   :  { %v1254_v24 = vld [vmem:[%s1750_s1] sm:$0xff]  }
 0x668   :  { %1296 = vtanh.f32 %v336_v23  ;;  %v1077_v28 = vmul.f32 -1.442695, %v336_v23  ;;  %1210 = vmatpush3.bf16.msra.mxu0 %v1254_v24 }
 0x669   :  { %1298 = vpow2.f32 %v1076_v27  ;;  %1211 = vmatprep.subr.bf16.mxu0 %v1390_v0 }
 0x66a   :  { %1300 = vpow2.f32 %v1077_v28 }
 0x670   :  { %v1295_v25 = vpop.eup %1294 }
 0x671   :  { %355 = vrot.lane.b32.xlu0 %v1295_v25, %s1393_s17  ;;  %v1255_v25 = vld [vmem:[%s1750_s1 + $0x8] sm:$0xff]  }
 0x672   :  { %v1297_v26 = vpop.eup %1296  ;;  %1212 = vmatpush3.bf16.msra.mxu0 %v1255_v25 }
 0x673   :  { %357 = vrot.lane.b32.xlu1 %v1297_v26, %s1393_s17  ;;  %v1299_v29 = vpop.eup %1298  ;;  %1225 = vmatprep.subr.bf16.mxu0 %v1390_v0 }
 0x674   :  { %v1301_v30 = vpop.eup %1300  ;;  %v343_v31 = vadd.f32 1.0, %v1299_v29 }
 0x675   :  { %v344_v32 = vadd.f32 1.0, %v1301_v30 }
 0x676   :  { %1302 = vrcp.f32 %v343_v31 }
 0x677   :  { %1304 = vrcp.f32 %v344_v32 }
 0x680   :  { %v1303_v33 = vpop.eup %1302 }
 0x681   :  { %v1305_v36 = vpop.eup %1304  ;;  %v351_v41 = vmul.f32 %v1303_v33, %v241_v3 }
 0x682   :  { %v352_v44 = vmul.f32 %v1305_v36, %v242_v6 }
 0x6e3   :  { %v356_v34 = vpop.permute.xlu0 %355 }
 0x6e4   :  { %v361_v35 = vmul.f32 %v1303_v33, %v356_v34  ;;  %v1093_v34 = vld [vmem:[%s1751_s0 + $0x40] sm:$0xff] }
 0x6e5   :  { %v358_v37 = vpop.permute.xlu1 %357 }
 0x6e6   :  { %365 = vrot.lane.b32.xlu0 %v361_v35, %s1394_s18  ;;  %v362_v40 = vmul.f32 %v1305_v36, %v358_v37 }
 0x6e8   :  { %367 = vrot.lane.b32.xlu1 %v362_v40, %s1394_s18 }
 0x758   :  { %v366_v42 = vpop.permute.xlu0 %365 }
 0x759   :  { %v371_v43 = vadd.f32 %v366_v42, %v351_v41 }
 0x75a   :  { %v368_v45 = vpop.permute.xlu1 %367 }
 0x75b   :  { %1306 = vtanh.f32 %v371_v43  ;;  %v372_v46 = vadd.f32 %v368_v45, %v352_v44 }
 0x75d   :  { %1308 = vtanh.f32 %v372_v46 }
 0x765   :  { %v1307_v49 = vpop.eup %1306 }
 0x766   :  { %377 = vrot.lane.b32.xlu0 %v1307_v49, %s1393_s17 }
 0x767   :  { %v1309_v50 = vpop.eup %1308 }
 0x768   :  { %379 = vrot.lane.b32.xlu1 %v1309_v50, %s1393_s17 }
 0x7d8   :  { %v378_v51 = vpop.permute.xlu0 %377 }
 0x7d9   :  { %v1506_v53 = vmul.f32 %v1303_v33, %v378_v51 }
 0x7da   :  { %v380_v52 = vpop.permute.xlu1 %379 }
 0x7db   :  { %v1508_v54 = vmul.f32 %v1305_v36, %v380_v52  ;;  %v1094_v36 = vld [vmem:[%s1751_s0 + $0x48] sm:$0xff] }
 0x7dd   :  { %v385_v55 = vpack.c.bf16 %v1508_v54, %v1506_v53 }
 0x7df   :  { %407 = vrot.lane.b32.xlu0 %v385_v55, %s1394_s18 }
 0x851   :  { %v408_v56 = vpop.permute.xlu0 %407 }
 0x852   :  { %1206 = vmatmul.mubr.msk.bf16.vlgmr.msra.gmra.mrb[4].mxu1 %vm30_vm1, %v408_v56 }
 0x853   :  { %1221 = vmatprep.mubr.msk.bf16.mxu1 %vm1391_vm0, %v1390_v0 }
 0x925   :  { %v458_v58 = vpop.f32.mrb[4].mxu1 }
 0x926   :  { %v465_v60 = vadd.f32 %v1082_v57, %v458_v58  ;;  %v1207_v61 = vpop.f32.mrb[5].mxu1 }
 0x927   :  { %v461_v62 = vpop.f32.mrb[6].mxu1 }
 0x928   :  { %1310 = vtanh.f32 %v465_v60  ;;  %v466_v63 = vadd.f32 %v1083_v59, %v461_v62  ;;  %v1208_v1 = vpop.f32.mrb[7].mxu1  ;;  %v1087_v4 = vmul.f32 -1.442695, %v465_v60 }
 0x92a   :  { %1312 = vtanh.f32 %v466_v63  ;;  %v1088_v5 = vmul.f32 -1.442695, %v466_v63 }
 0x92b   :  { %1314 = vpow2.f32 %v1087_v4  ;;  %v1257_v4 = vld [vmem:[%s1750_s1 + $0x8] sm:$0xff]  }
 0x92c   :  { %1316 = vpow2.f32 %v1088_v5 }
 0x932   :  { %v1311_v2 = vpop.eup %1310 }
 0x933   :  { %485 = vrot.lane.b32.xlu1 %v1311_v2, %s1393_s17 }
 0x934   :  { %v1313_v3 = vpop.eup %1312 }
 0x935   :  { %487 = vrot.lane.b32.xlu0 %v1313_v3, %s1393_s17  ;;  %v1315_v6 = vpop.eup %1314  ;;  %v1256_v3 = vld [vmem:[%s1750_s1] sm:$0xff]  }
 0x936   :  { %v1317_v7 = vpop.eup %1316  ;;  %v473_v8 = vadd.f32 1.0, %v1315_v6  ;;  %1218 = vmatpush3.bf16.msra.mxu1 %v1256_v3 }
 0x937   :  { %v474_v9 = vadd.f32 1.0, %v1317_v7  ;;  %1219 = vmatprep.subr.bf16.mxu1 %v1390_v0 }
 0x938   :  { %1318 = vrcp.f32 %v473_v8 }
 0x939   :  { %1320 = vrcp.f32 %v474_v9 }
 0x93a   :  { %1220 = vmatpush3.bf16.msra.mxu1 %v1257_v4 }
 0x93b   :  { %1233 = vmatprep.subr.bf16.mxu1 %v1390_v0 }
 0x942   :  { %v1319_v10 = vpop.eup %1318 }
 0x943   :  { %v1321_v15 = vpop.eup %1320  ;;  %v481_v18 = vmul.f32 %v1319_v10, %v371_v43 }
 0x944   :  { %v482_v21 = vmul.f32 %v1321_v15, %v372_v46 }
 0x9a5   :  { %v486_v11 = vpop.permute.xlu1 %485 }
 0x9a6   :  { %v491_v12 = vmul.f32 %v1319_v10, %v486_v11 }
 0x9a7   :  { %v488_v16 = vpop.permute.xlu0 %487 }
 0x9a8   :  { %495 = vrot.lane.b32.xlu1 %v491_v12, %s1394_s18  ;;  %v492_v17 = vmul.f32 %v1321_v15, %v488_v16 }
 0x9aa   :  { %497 = vrot.lane.b32.xlu0 %v492_v17, %s1394_s18  ;;  %v1105_v17 = vld [vmem:[%s1751_s0 + $0x58] sm:$0xff] }
 0xa1a   :  { %v496_v19 = vpop.permute.xlu1 %495 }
 0xa1b   :  { %v501_v20 = vadd.f32 %v496_v19, %v481_v18 }
 0xa1c   :  { %v498_v22 = vpop.permute.xlu0 %497 }
 0xa1d   :  { %1322 = vtanh.f32 %v501_v20  ;;  %v502_v23 = vadd.f32 %v498_v22, %v482_v21 }
 0xa1f   :  { %1324 = vtanh.f32 %v502_v23 }
 0xa27   :  { %v1323_v26 = vpop.eup %1322 }
 0xa28   :  { %507 = vrot.lane.b32.xlu1 %v1323_v26, %s1393_s17 }
 0xa29   :  { %v1325_v27 = vpop.eup %1324 }
 0xa2a   :  { %509 = vrot.lane.b32.xlu0 %v1325_v27, %s1393_s17 }
 0xa9a   :  { %v508_v28 = vpop.permute.xlu1 %507 }
 0xa9b   :  { %v1536_v30 = vmul.f32 %v1319_v10, %v508_v28 }
 0xa9c   :  { %v510_v29 = vpop.permute.xlu0 %509 }
 0xa9d   :  { %v1538_v31 = vmul.f32 %v1321_v15, %v510_v29  ;;  %v1104_v15 = vld [vmem:[%s1751_s0 + $0x50] sm:$0xff] }
 0xa9f   :  { %v515_v32 = vpack.c.bf16 %v1538_v31, %v1536_v30 }
 0xaa1   :  { %537 = vrot.lane.b32.xlu1 %v515_v32, %s1394_s18 }
 0xb13   :  { %v538_v33 = vpop.permute.xlu1 %537 }
 0xb14   :  { %1214 = vmatmul.mubr.msk.bf16.vlgmr.msra.gmra.mrb[8].mxu0 %vm30_vm1, %v538_v33 }
 0xb15   :  { %1229 = vmatprep.mubr.msk.bf16.mxu0 %vm1391_vm0, %v1390_v0 }
 0xbe7   :  { %v588_v35 = vpop.f32.mrb[8].mxu0 }
 0xbe8   :  { %v595_v37 = vadd.f32 %v1093_v34, %v588_v35  ;;  %v1215_v40 = vpop.f32.mrb[9].mxu0 }
 0xbe9   :  { %v591_v41 = vpop.f32.mrb[10].mxu0 }
 0xbea   :  { %1326 = vtanh.f32 %v595_v37  ;;  %v596_v42 = vadd.f32 %v1094_v36, %v591_v41  ;;  %v1216_v43 = vpop.f32.mrb[11].mxu0  ;;  %v1098_v46 = vmul.f32 -1.442695, %v595_v37 }
 0xbec   :  { %1328 = vtanh.f32 %v596_v42  ;;  %v1099_v47 = vmul.f32 -1.442695, %v596_v42 }
 0xbed   :  { %1330 = vpow2.f32 %v1098_v46 }
 0xbee   :  { %1332 = vpow2.f32 %v1099_v47  ;;  %v1258_v47 = vld [vmem:[%s1750_s1] sm:$0xff]  }
 0xbef   :  { %1226 = vmatpush3.bf16.msra.mxu0 %v1258_v47 }
 0xbf0   :  { %1227 = vmatprep.subr.bf16.mxu0 %v1390_v0 }
 0xbf4   :  { %v1327_v44 = vpop.eup %1326 }
 0xbf5   :  { %615 = vrot.lane.b32.xlu0 %v1327_v44, %s1393_s17 }
 0xbf6   :  { %v1329_v45 = vpop.eup %1328 }
 0xbf7   :  { %617 = vrot.lane.b32.xlu1 %v1329_v45, %s1393_s17  ;;  %v1331_v48 = vpop.eup %1330 }
 0xbf8   :  { %v1333_v49 = vpop.eup %1332  ;;  %v603_v50 = vadd.f32 1.0, %v1331_v48  ;;  %v1259_v48 = vld [vmem:[%s1750_s1 + $0x8] sm:$0xff]  }
 0xbf9   :  { %v604_v51 = vadd.f32 1.0, %v1333_v49  ;;  %1228 = vmatpush3.bf16.msra.mxu0 %v1259_v48 }
 0xbfa   :  { %1334 = vrcp.f32 %v603_v50 }
 0xbfb   :  { %1336 = vrcp.f32 %v604_v51 }
 0xc04   :  { %v1335_v52 = vpop.eup %1334 }
 0xc05   :  { %v1337_v57 = vpop.eup %1336  ;;  %v611_v60 = vmul.f32 %v1335_v52, %v501_v20 }
 0xc06   :  { %v612_v63 = vmul.f32 %v1337_v57, %v502_v23 }
 0xc67   :  { %v616_v55 = vpop.permute.xlu0 %615 }
 0xc68   :  { %v621_v56 = vmul.f32 %v1335_v52, %v616_v55 }
 0xc69   :  { %v618_v58 = vpop.permute.xlu1 %617 }
 0xc6a   :  { %625 = vrot.lane.b32.xlu0 %v621_v56, %s1394_s18  ;;  %v622_v59 = vmul.f32 %v1337_v57, %v618_v58 }
 0xc6c   :  { %627 = vrot.lane.b32.xlu1 %v622_v59, %s1394_s18  ;;  %v1115_v59 = vld [vmem:[%s1751_s0 + $0x60] sm:$0xff] }
 0xcdc   :  { %v626_v61 = vpop.permute.xlu0 %625 }
 0xcdd   :  { %v631_v62 = vadd.f32 %v626_v61, %v611_v60  ;;  %v1116_v61 = vld [vmem:[%s1751_s0 + $0x68] sm:$0xff] }
 0xcde   :  { %v628_v1 = vpop.permute.xlu1 %627 }
 0xcdf   :  { %1338 = vtanh.f32 %v631_v62  ;;  %v632_v2 = vadd.f32 %v628_v1, %v612_v63 }
 0xce1   :  { %1340 = vtanh.f32 %v632_v2 }
 0xce9   :  { %v1339_v5 = vpop.eup %1338 }
 0xcea   :  { %637 = vrot.lane.b32.xlu0 %v1339_v5, %s1393_s17 }
 0xceb   :  { %v1341_v6 = vpop.eup %1340 }
 0xcec   :  { %639 = vrot.lane.b32.xlu1 %v1341_v6, %s1393_s17 }
 0xd5c   :  { %v638_v7 = vpop.permute.xlu0 %637 }
 0xd5d   :  { %v1566_v9 = vmul.f32 %v1335_v52, %v638_v7 }
 0xd5e   :  { %v640_v8 = vpop.permute.xlu1 %639 }
 0xd5f   :  { %v1568_v10 = vmul.f32 %v1337_v57, %v640_v8 }
 0xd61   :  { %v645_v11 = vpack.c.bf16 %v1568_v10, %v1566_v9 }
 0xd63   :  { %667 = vrot.lane.b32.xlu0 %v645_v11, %s1394_s18 }
 0xdd5   :  { %v668_v12 = vpop.permute.xlu0 %667 }
 0xdd6   :  { %1222 = vmatmul.mubr.msk.bf16.vlgmr.msra.gmra.mrb[8].mxu1 %vm30_vm1, %v668_v12 }
 0xdd7   :  { %1237 = vmatprep.mubr.msk.bf16.mxu1 %vm1391_vm0, %v1390_v0 }
 0xea9   :  { %v718_v16 = vpop.f32.mrb[8].mxu1 }
 0xeaa   :  { %v725_v18 = vadd.f32 %v1104_v15, %v718_v16  ;;  %v1223_v19 = vpop.f32.mrb[9].mxu1 }
 0xeab   :  { %v721_v20 = vpop.f32.mrb[10].mxu1 }
 0xeac   :  { %1342 = vtanh.f32 %v725_v18  ;;  %v726_v21 = vadd.f32 %v1105_v17, %v721_v20  ;;  %v1224_v22 = vpop.f32.mrb[11].mxu1  ;;  %v1109_v25 = vmul.f32 -1.442695, %v725_v18 }
 0xeae   :  { %1344 = vtanh.f32 %v726_v21  ;;  %v1110_v26 = vmul.f32 -1.442695, %v726_v21 }
 0xeaf   :  { %1346 = vpow2.f32 %v1109_v25 }
 0xeb0   :  { %1348 = vpow2.f32 %v1110_v26 }
 0xeb6   :  { %v1343_v23 = vpop.eup %1342 }
 0xeb7   :  { %745 = vrot.lane.b32.xlu1 %v1343_v23, %s1393_s17 }
 0xeb8   :  { %v1345_v24 = vpop.eup %1344 }
 0xeb9   :  { %747 = vrot.lane.b32.xlu0 %v1345_v24, %s1393_s17  ;;  %v1347_v27 = vpop.eup %1346 }
 0xeba   :  { %v1349_v28 = vpop.eup %1348  ;;  %v733_v29 = vadd.f32 1.0, %v1347_v27 }
 0xebb   :  { %v734_v32 = vadd.f32 1.0, %v1349_v28  ;;  %v1260_v28 = vld [vmem:[%s1750_s1] sm:$0xff]  }
 0xebc   :  { %1350 = vrcp.f32 %v733_v29  ;;  %1234 = vmatpush3.bf16.msra.mxu1 %v1260_v28  ;;  %v1261_v29 = vld [vmem:[%s1750_s1 + $0x8] sm:$0xff]  }
 0xebd   :  { %1352 = vrcp.f32 %v734_v32  ;;  %1235 = vmatprep.subr.bf16.mxu1 %v1390_v0  ;;  %v1126_v0 = vld [vmem:[%s1751_s0 + $0x70] sm:$0xff] }
 0xec0   :  { %1236 = vmatpush3.bf16.msra.mxu1 %v1261_v29 }
 0xec6   :  { %v1351_v33 = vpop.eup %1350 }
 0xec7   :  { %v1353_v36 = vpop.eup %1352  ;;  %v741_v41 = vmul.f32 %v1351_v33, %v631_v62 }
 0xec8   :  { %v742_v44 = vmul.f32 %v1353_v36, %v632_v2 }
 0xf29   :  { %v746_v34 = vpop.permute.xlu1 %745 }
 0xf2a   :  { %v751_v35 = vmul.f32 %v1351_v33, %v746_v34 }
 0xf2b   :  { %v748_v37 = vpop.permute.xlu0 %747 }
 0xf2c   :  { %755 = vrot.lane.b32.xlu1 %v751_v35, %s1394_s18  ;;  %v752_v40 = vmul.f32 %v1353_v36, %v748_v37 }
 0xf2e   :  { %757 = vrot.lane.b32.xlu0 %v752_v40, %s1394_s18 }
 0xf9e   :  { %v756_v42 = vpop.permute.xlu1 %755 }
 0xf9f   :  { %v761_v43 = vadd.f32 %v756_v42, %v741_v41 }
 0xfa0   :  { %v758_v45 = vpop.permute.xlu0 %757 }
 0xfa1   :  { %1354 = vtanh.f32 %v761_v43  ;;  %v762_v46 = vadd.f32 %v758_v45, %v742_v44 }
 0xfa3   :  { %1356 = vtanh.f32 %v762_v46 }
 0xfab   :  { %v1355_v49 = vpop.eup %1354 }
 0xfac   :  { %767 = vrot.lane.b32.xlu1 %v1355_v49, %s1393_s17 }
 0xfad   :  { %v1357_v50 = vpop.eup %1356 }
 0xfae   :  { %769 = vrot.lane.b32.xlu0 %v1357_v50, %s1393_s17 }
0x101e   :  { %v768_v51 = vpop.permute.xlu1 %767 }
0x101f   :  { %v1595_v55 = vmul.f32 %v1351_v33, %v768_v51 }
0x1020   :  { %v770_v52 = vpop.permute.xlu0 %769 }
0x1021   :  { %v1597_v56 = vmul.f32 %v1353_v36, %v770_v52 }
0x1023   :  { %v775_v57 = vpack.c.bf16 %v1597_v56, %v1595_v55 }
0x1025   :  { %797 = vrot.lane.b32.xlu1 %v775_v57, %s1394_s18 }
0x1097   :  { %v798_v58 = vpop.permute.xlu1 %797 }
0x1098   :  { %1230 = vmatmul.mubr.msk.bf16.vlgmr.msra.gmra.mrb[12].mxu0 %vm30_vm1, %v798_v58 }
0x116b   :  { %v848_v60 = vpop.f32.mrb[12].mxu0 }
0x116c   :  { %v855_v62 = vadd.f32 %v1115_v59, %v848_v60  ;;  %v1231_v63 = vpop.f32.mrb[13].mxu0 }
0x116d   :  { %v851_v1 = vpop.f32.mrb[14].mxu0 }
0x116e   :  { %1358 = vtanh.f32 %v855_v62  ;;  %v856_v2 = vadd.f32 %v1116_v61, %v851_v1  ;;  %v1232_v3 = vpop.f32.mrb[15].mxu0  ;;  %v1120_v6 = vmul.f32 -1.442695, %v855_v62 }
0x1170   :  { %1360 = vtanh.f32 %v856_v2  ;;  %v1121_v7 = vmul.f32 -1.442695, %v856_v2 }
0x1171   :  { %1362 = vpow2.f32 %v1120_v6 }
0x1172   :  { %1364 = vpow2.f32 %v1121_v7 }
0x1178   :  { %v1359_v4 = vpop.eup %1358 }
0x1179   :  { %875 = vrot.lane.b32.xlu0 %v1359_v4, %s1393_s17 }
0x117a   :  { %v1361_v5 = vpop.eup %1360 }
0x117b   :  { %877 = vrot.lane.b32.xlu1 %v1361_v5, %s1393_s17  ;;  %v1363_v8 = vpop.eup %1362 }
0x117c   :  { %v1365_v11 = vpop.eup %1364  ;;  %v863_v12 = vadd.f32 1.0, %v1363_v8 }
0x117d   :  { %v864_v15 = vadd.f32 1.0, %v1365_v11 }
0x117e   :  { %1366 = vrcp.f32 %v863_v12 }
0x117f   :  { %1368 = vrcp.f32 %v864_v15 }
0x1188   :  { %v1367_v16 = vpop.eup %1366 }
0x1189   :  { %v1369_v19 = vpop.eup %1368  ;;  %v871_v22 = vmul.f32 %v1367_v16, %v761_v43  ;;  %v1127_v43 = vld [vmem:[%s1751_s0 + $0x78] sm:$0xff] }
0x118a   :  { %v872_v25 = vmul.f32 %v1369_v19, %v762_v46 }
0x11eb   :  { %v876_v17 = vpop.permute.xlu0 %875 }
0x11ec   :  { %v881_v18 = vmul.f32 %v1367_v16, %v876_v17  ;;  %v1138_v17 = vpack.c.bf16 %v1448_v39, %v1448_v39  ;;  %v1142_v39 = vpack.c.bf16 %v1508_v54, %v1508_v54  ;;  %v1146_v54 = vpack.c.bf16 %v1568_v10, %v1568_v10 }
0x11ed   :  { %v878_v20 = vpop.permute.xlu1 %877 }
0x11ee   :  { %885 = vrot.lane.b32.xlu0 %v881_v18, %s1394_s18  ;;  %v882_v21 = vmul.f32 %v1369_v19, %v878_v20  ;;  %v1139_v18 = vpack.c.bf16 %v1476_v13, %v1476_v13  ;;  %v1143_v13 = vpack.c.bf16 %v1536_v30, %v1536_v30  ;;  %v1147_v30 = vpack.c.bf16 %v1595_v55, %v1595_v55 }
0x11f0   :  { %887 = vrot.lane.b32.xlu1 %v882_v21, %s1394_s18 }
0x1260   :  { %v886_v23 = vpop.permute.xlu0 %885 }
0x1261   :  { %v891_v24 = vadd.f32 %v886_v23, %v871_v22 }
0x1262   :  { %v888_v26 = vpop.permute.xlu1 %887 }
0x1263   :  { %1370 = vtanh.f32 %v891_v24  ;;  %v892_v27 = vadd.f32 %v888_v26, %v872_v25 }
0x1265   :  { %1372 = vtanh.f32 %v892_v27 }
0x126d   :  { %v1371_v32 = vpop.eup %1370 }
0x126e   :  { %897 = vrot.lane.b32.xlu0 %v1371_v32, %s1393_s17 }
0x126f   :  { %v1373_v33 = vpop.eup %1372 }
0x1270   :  { %899 = vrot.lane.b32.xlu1 %v1373_v33, %s1393_s17 }
0x12e0   :  { %v898_v34 = vpop.permute.xlu0 %897 }
0x12e1   :  { %v1622_v36 = vmul.f32 %v1367_v16, %v898_v34  ;;  %v1137_v16 = vpack.c.bf16 %v1446_v38, %v1446_v38  ;;  %v1141_v38 = vpack.c.bf16 %v1506_v53, %v1506_v53  ;;  %v1145_v53 = vpack.c.bf16 %v1566_v9, %v1566_v9 }
0x12e2   :  { %v900_v35 = vpop.permute.xlu1 %899 }
0x12e3   :  { %v1624_v37 = vmul.f32 %v1369_v19, %v900_v35  ;;  %v1140_v19 = vpack.c.bf16 %v1478_v14, %v1478_v14  ;;  %v1144_v14 = vpack.c.bf16 %v1538_v31, %v1538_v31  ;;  %v1148_v31 = vpack.c.bf16 %v1597_v56, %v1597_v56 }
0x12e4   :  { %v1149_v9 = vpack.c.bf16 %v1622_v36, %v1622_v36 }
0x12e5   :  { %v905_v40 = vpack.c.bf16 %v1624_v37, %v1622_v36  ;;  %v1150_v10 = vpack.c.bf16 %v1624_v37, %v1624_v37 }
0x12e7   :  { %927 = vrot.lane.b32.xlu0 %v905_v40, %s1394_s18 }
0x1359   :  { %v928_v41 = vpop.permute.xlu0 %927 }
0x135a   :  { %1238 = vmatmul.mubr.msk.bf16.vlgmr.msra.gmra.mrb[12].mxu1 %vm30_vm1, %v928_v41 }
0x142d   :  { %v978_v42 = vpop.f32.mrb[12].mxu1 }
0x142e   :  { %v985_v44 = vadd.f32 %v1126_v0, %v978_v42  ;;  %v1239_v45 = vpop.f32.mrb[13].mxu1 }
0x142f   :  { %v981_v46 = vpop.f32.mrb[14].mxu1 }
0x1430   :  { %1374 = vtanh.f32 %v985_v44  ;;  %v986_v47 = vadd.f32 %v1127_v43, %v981_v46  ;;  %v1240_v48 = vpop.f32.mrb[15].mxu1  ;;  %v1131_v51 = vmul.f32 -1.442695, %v985_v44 }
0x1432   :  { %1376 = vtanh.f32 %v986_v47  ;;  %v1132_v52 = vmul.f32 -1.442695, %v986_v47 }
0x1433   :  { %1378 = vpow2.f32 %v1131_v51 }
0x1434   :  { %1380 = vpow2.f32 %v1132_v52 }
0x143a   :  { %v1375_v49 = vpop.eup %1374 }
0x143b   :  { %1005 = vrot.lane.b32.xlu1 %v1375_v49, %s1393_s17 }
0x143c   :  { %v1377_v50 = vpop.eup %1376 }
0x143d   :  { %1007 = vrot.lane.b32.xlu0 %v1377_v50, %s1393_s17  ;;  %v1379_v57 = vpop.eup %1378 }
0x143e   :  { %v1381_v58 = vpop.eup %1380  ;;  %v993_v59 = vadd.f32 1.0, %v1379_v57 }
0x143f   :  { %v994_v60 = vadd.f32 1.0, %v1381_v58 }
0x1440   :  { %1382 = vrcp.f32 %v993_v59 }
0x1441   :  { %1384 = vrcp.f32 %v994_v60 }
0x144a   :  { %v1383_v61 = vpop.eup %1382 }
0x144b   :  { %v1385_v1 = vpop.eup %1384  ;;  %v1001_v4 = vmul.f32 %v1383_v61, %v891_v24 }
0x144c   :  { %v1002_v7 = vmul.f32 %v1385_v1, %v892_v27 }
0x14ad   :  { %v1006_v62 = vpop.permute.xlu1 %1005 }
0x14ae   :  { %v1011_v63 = vmul.f32 %v1383_v61, %v1006_v62 }
0x14af   :  { %v1008_v2 = vpop.permute.xlu0 %1007 }
0x14b0   :  { %1015 = vrot.lane.b32.xlu1 %v1011_v63, %s1394_s18  ;;  %v1012_v3 = vmul.f32 %v1385_v1, %v1008_v2 }
0x14b2   :  { %1017 = vrot.lane.b32.xlu0 %v1012_v3, %s1394_s18 }
0x1522   :  { %v1016_v5 = vpop.permute.xlu1 %1015 }
0x1523   :  { %v1021_v6 = vadd.f32 %v1016_v5, %v1001_v4 }
0x1524   :  { %v1018_v8 = vpop.permute.xlu0 %1017 }
0x1525   :  { %1386 = vtanh.f32 %v1021_v6  ;;  %v1022_v11 = vadd.f32 %v1018_v8, %v1002_v7 }
0x1527   :  { %1388 = vtanh.f32 %v1022_v11 }
0x152f   :  { %v1387_v12 = vpop.eup %1386 }
0x1530   :  { %1027 = vrot.lane.b32.xlu1 %v1387_v12, %s1393_s17 }
0x1531   :  { %v1389_v15 = vpop.eup %1388 }
0x1532   :  { %1029 = vrot.lane.b32.xlu0 %v1389_v15, %s1393_s17 }
0x1534   :  { %131 = vrot.lane.b32.xlu1 %v1137_v16, %s1394_s18 }
0x1536   :  { %133 = vrot.lane.b32.xlu0 %v1138_v17, %s1394_s18 }
0x1538   :  { %261 = vrot.lane.b32.xlu1 %v1139_v18, %s1394_s18 }
0x153a   :  { %263 = vrot.lane.b32.xlu0 %v1140_v19, %s1394_s18 }
0x153c   :  { %391 = vrot.lane.b32.xlu1 %v1141_v38, %s1394_s18 }
0x153e   :  { %393 = vrot.lane.b32.xlu0 %v1142_v39, %s1394_s18 }
0x1540   :  { %521 = vrot.lane.b32.xlu1 %v1143_v13, %s1394_s18 }
0x1542   :  { %523 = vrot.lane.b32.xlu0 %v1144_v14, %s1394_s18 }
0x1544   :  { %651 = vrot.lane.b32.xlu1 %v1145_v53, %s1394_s18 }
0x1546   :  { %653 = vrot.lane.b32.xlu0 %v1146_v54, %s1394_s18 }
0x1548   :  { %781 = vrot.lane.b32.xlu1 %v1147_v30, %s1394_s18 }
0x154a   :  { %783 = vrot.lane.b32.xlu0 %v1148_v31, %s1394_s18 }
0x154c   :  { %911 = vrot.lane.b32.xlu1 %v1149_v9, %s1394_s18 }
0x154e   :  { %913 = vrot.lane.b32.xlu0 %v1150_v10, %s1394_s18 }
0x15a2   :  { %v1028_v55 = vpop.permute.xlu1 %1027 }
0x15a3   :  { %v1033_v20 = vmul.f32 %v1383_v61, %v1028_v55 }
0x15a4   :  { %v1030_v22 = vpop.permute.xlu0 %1029 }
0x15a5   :  { %v1151_v21 = vpack.c.bf16 %v1033_v20, %v1033_v20  ;;  %v1034_v23 = vmul.f32 %v1385_v1, %v1030_v22 }
0x15a6   :  { %v132_v24 = vpop.permute.xlu1 %131 }
0x15a7   :  { %138 = vst.msk [vmem:[%s1752_s2] sm:$0xf] %vm137_vm2, %v132_v24  ;;  %1041 = vrot.lane.b32.xlu1 %v1151_v21, %s1394_s18  ;;  %v1152_v56 = vpack.c.bf16 %v1034_v23, %v1034_v23 }
0x15a8   :  { %v134_v25 = vpop.permute.xlu0 %133 }
0x15a9   :  { %139 = vst.msk [vmem:[%s1752_s2 + $0x4] sm:$0xf] %vm137_vm2, %v134_v25  ;;  %1043 = vrot.lane.b32.xlu0 %v1152_v56, %s1394_s18 }
0x15aa   :  { %v262_v26 = vpop.permute.xlu1 %261 }
0x15ab   :  { %1069 = vst.msk [vmem:[%s1752_s2 + $0x8] sm:$0xf] %vm137_vm2, %v262_v26 }
0x15ac   :  { %v264_v27 = vpop.permute.xlu0 %263 }
0x15ad   :  { %1070 = vst.msk [vmem:[%s1752_s2 + $0xc] sm:$0xf] %vm137_vm2, %v264_v27 }
0x15ae   :  { %v392_v28 = vpop.permute.xlu1 %391 }
0x15af   :  { %1080 = vst.msk [vmem:[%s1752_s2 + $0x10] sm:$0xf] %vm137_vm2, %v392_v28 }
0x15b0   :  { %v394_v29 = vpop.permute.xlu0 %393 }
0x15b1   :  { %1081 = vst.msk [vmem:[%s1752_s2 + $0x14] sm:$0xf] %vm137_vm2, %v394_v29 }
0x15b2   :  { %v522_v32 = vpop.permute.xlu1 %521 }
0x15b3   :  { %1091 = vst.msk [vmem:[%s1752_s2 + $0x18] sm:$0xf] %vm137_vm2, %v522_v32 }
0x15b4   :  { %v524_v33 = vpop.permute.xlu0 %523 }
0x15b5   :  { %1092 = vst.msk [vmem:[%s1752_s2 + $0x1c] sm:$0xf] %vm137_vm2, %v524_v33 }
0x15b6   :  { %v652_v34 = vpop.permute.xlu1 %651 }
0x15b7   :  { %1102 = vst.msk [vmem:[%s1752_s2 + $0x20] sm:$0xf] %vm137_vm2, %v652_v34 }
0x15b8   :  { %v654_v35 = vpop.permute.xlu0 %653 }
0x15b9   :  { %1103 = vst.msk [vmem:[%s1752_s2 + $0x24] sm:$0xf] %vm137_vm2, %v654_v35 }
0x15ba   :  { %v782_v36 = vpop.permute.xlu1 %781 }
0x15bb   :  { %1113 = vst.msk [vmem:[%s1752_s2 + $0x28] sm:$0xf] %vm137_vm2, %v782_v36 }
0x15bc   :  { %v784_v37 = vpop.permute.xlu0 %783 }
0x15bd   :  { %1114 = vst.msk [vmem:[%s1752_s2 + $0x2c] sm:$0xf] %vm137_vm2, %v784_v37 }
0x15be   :  { %v912_v40 = vpop.permute.xlu1 %911 }
0x15bf   :  { %1124 = vst.msk [vmem:[%s1752_s2 + $0x30] sm:$0xf] %vm137_vm2, %v912_v40 }
0x15c0   :  { %v914_v41 = vpop.permute.xlu0 %913 }
0x15c1   :  { %1125 = vst.msk [vmem:[%s1752_s2 + $0x34] sm:$0xf] %vm137_vm2, %v914_v41 }
0x1619   :  { %v1042_v0 = vpop.permute.xlu1 %1041 }
0x161a   :  { %1135 = vst.msk [vmem:[%s1752_s2 + $0x38] sm:$0xf] %vm137_vm2, %v1042_v0 }
0x161b   :  { %v1044_v42 = vpop.permute.xlu0 %1043 }
0x161c   :  { %1136 = vst.msk [vmem:[%s1752_s2 + $0x3c] sm:$0xf] %vm137_vm2, %v1044_v42 }

</bundles_post_ra>
